<compile_context>
chip_gen: v7x
topology: tpu7x:2x2x1
jax: 0.10.0
libtpu: 0.0.40
codegen_flags: <defaults>
</compile_context>

<pallas_src>
import jax
import jax.numpy as jnp
from jax.experimental import pallas as pl
from jax.experimental.pallas import tpu as pltpu

_C = 128  # lane-padded channel width


def _round8(n: int) -> int:
    return ((n + 7) // 8) * 8


# ---------------------------------------------------------------------------
# Fused Pallas kernel: encoder (2 hetero SAGE layers) + edge decoder
# ---------------------------------------------------------------------------
def _fused_forward_kernel(a_act_ref, a_mov_ref, xm_ref, xa_ref,
                          w1a_ref, b1a_ref, w1m_ref, b1m_ref,
                          w2a_ref, b2a_ref, w2m_ref, b2m_ref,
                          selm_ref, sela_ref, wd1_ref, bd1_ref,
                          wd2_ref, bd2_ref, o_ref):
    def sage(a, x_src, x_dst, w_ref, b_ref, relu):
        # mean-aggregated neighbors (dense adjacency matmul), then
        # agg @ W_l + x_dst @ W_r + b.  Static ref slices are free views, so
        # no (N, 2C) concat buffer is materialized.
        agg = jnp.dot(a, x_src, preferred_element_type=jnp.float32)
        out = (jnp.dot(agg, w_ref[:_C, :], preferred_element_type=jnp.float32)
               + jnp.dot(x_dst, w_ref[_C:, :],
                         preferred_element_type=jnp.float32)
               + b_ref[...])
        return jnp.maximum(out, 0.0) if relu else out

    x_m = xm_ref[...]
    x_a = xa_ref[...]
    a_act = a_act_ref[...]
    a_mov = a_mov_ref[...]

    # layer 1 (+relu); aggr='sum' over edge types is trivial (1 edge type/dst)
    h_a = sage(a_act, x_m, x_a, w1a_ref, b1a_ref, True)
    h_m = sage(a_mov, x_a, x_m, w1m_ref, b1m_ref, True)
    # layer 2 (no relu)
    z_a = sage(a_act, h_m, h_a, w2a_ref, b2a_ref, False)
    z_m = sage(a_mov, h_a, h_m, w2m_ref, b2m_ref, False)

    # decoder: in-kernel gather via one-hot selection matmuls (MXU-friendly)
    zm_sel = jnp.dot(selm_ref[...], z_m, preferred_element_type=jnp.float32)
    za_sel = jnp.dot(sela_ref[...], z_a, preferred_element_type=jnp.float32)
    h = jnp.maximum(
        jnp.dot(zm_sel, wd1_ref[:_C, :], preferred_element_type=jnp.float32)
        + jnp.dot(za_sel, wd1_ref[_C:, :], preferred_element_type=jnp.float32)
        + bd1_ref[...], 0.0)
    # final (H,1) projection as a VPU lane-reduction (frees the MXU)
    scores = jnp.sum(h * wd2_ref[...], axis=-1, keepdims=True) + bd2_ref[...]
    # lane-dense unmasked store: broadcast score over all 128 lanes
    o_ref[...] = jnp.broadcast_to(scores, o_ref.shape)


def fused_forward(a_act, a_mov, xm_p, xa_p, params, sel_m, sel_a, e_p):
    p = params
    inputs = (a_act, a_mov, xm_p, xa_p,
              p['w1_act'], p['b1_act'], p['w1_mov'], p['b1_mov'],
              p['w2_act'], p['b2_act'], p['w2_mov'], p['b2_mov'],
              sel_m, sel_a, p['wd1'], p['bd1'], p['wd2'], p['bd2'])

    def full(shape):
        return pl.BlockSpec(shape, lambda i: (0,) * len(shape))

    return pl.pallas_call(
        _fused_forward_kernel,
        grid=(1,),
        out_shape=jax.ShapeDtypeStruct((e_p, _C), jnp.float32),
        in_specs=[full(x.shape) for x in inputs],
        out_specs=full((e_p, _C)),
        compiler_params=pltpu.CompilerParams(
            dimension_semantics=("arbitrary",)),
    )(*inputs)


# ---------------------------------------------------------------------------
# Glue (plain JAX): adjacency / selection construction, parameter setup
# ---------------------------------------------------------------------------
def dense_mean_adj(edge_index, n_src_p, n_dst_p):
    """Row-normalized dense A[dst, src] = (#edges dst<-src)/deg(dst) (0 if
    isolated).  Built with one-hot comparisons + matmul (no serialized
    scatter); matches PyG mean aggregation incl. duplicate edges."""
    src, dst = edge_index[0], edge_index[1]
    oh_dst = (dst[:, None] == jnp.arange(n_dst_p)[None, :]).astype(jnp.float32)
    oh_src = (src[:, None] == jnp.arange(n_src_p)[None, :]).astype(jnp.float32)
    a = oh_dst.T @ oh_src                       # (n_dst_p, n_src_p) edge counts
    deg = a.sum(axis=1, keepdims=True)
    return a / jnp.maximum(deg, 1.0)


def onehot_select(idx, n_p, e_p):
    """(E_p, n_p) one-hot row-selection matrix; padded edges select nothing."""
    pad = jnp.full((e_p - idx.shape[0],), -1, idx.dtype)
    idx_p = jnp.concatenate([idx, pad])
    return (idx_p[:, None] == jnp.arange(n_p)[None, :]).astype(jnp.float32)


def _pad2(a, rows, cols):
    return jnp.pad(a, ((0, rows - a.shape[0]), (0, cols - a.shape[1])))


def init_params(key, hidden, f_movie, f_actor):
    assert max(hidden, f_movie, f_actor) <= _C
    ks = iter(jax.random.split(key, 16))

    def lin_w(k, fan_in, fan_out):
        bound = 1.0 / jnp.sqrt(jnp.float32(fan_in))
        return jax.random.uniform(k, (fan_in, fan_out), jnp.float32,
                                  -bound, bound)

    def lin_b(k, fan_in, fan_out):
        bound = 1.0 / jnp.sqrt(jnp.float32(fan_in))
        b = jax.random.uniform(k, (fan_out,), jnp.float32, -bound, bound)
        return jnp.pad(b, (0, _C - fan_out)).reshape(1, _C)

    def fuse(w_l, w_r):
        # (2C, C): rows [0:C) act on the aggregated-src operand, rows [C:2C)
        # on the x_dst operand.  Zero padding keeps padded channels/rows
        # exactly zero through the network.
        return jnp.concatenate([_pad2(w_l, _C, _C), _pad2(w_r, _C, _C)], axis=0)

    p = {}
    # ---- layer 1 (to_hetero: one SAGEConv per edge type) ----
    # dst=actor (src=movie)
    p['w1_act'] = fuse(lin_w(next(ks), f_movie, hidden),
                       lin_w(next(ks), f_actor, hidden))
    p['b1_act'] = lin_b(next(ks), f_movie, hidden)
    # dst=movie (src=actor)
    p['w1_mov'] = fuse(lin_w(next(ks), f_actor, hidden),
                       lin_w(next(ks), f_movie, hidden))
    p['b1_mov'] = lin_b(next(ks), f_actor, hidden)
    # ---- layer 2 ----
    p['w2_act'] = fuse(lin_w(next(ks), hidden, hidden),
                       lin_w(next(ks), hidden, hidden))
    p['b2_act'] = lin_b(next(ks), hidden, hidden)
    p['w2_mov'] = fuse(lin_w(next(ks), hidden, hidden),
                       lin_w(next(ks), hidden, hidden))
    p['b2_mov'] = lin_b(next(ks), hidden, hidden)
    # ---- edge decoder ----
    w_lin1 = lin_w(next(ks), 2 * hidden, hidden)
    p['wd1'] = fuse(w_lin1[:hidden], w_lin1[hidden:])   # cat([z_m,z_a]) @ W1
    p['bd1'] = lin_b(next(ks), 2 * hidden, hidden)
    w_lin2 = lin_w(next(ks), hidden, 1)                 # (hidden, 1)
    p['wd2'] = jnp.pad(w_lin2[:, 0], (0, _C - hidden)).reshape(1, _C)
    bound2 = 1.0 / jnp.sqrt(jnp.float32(hidden))
    p['bd2'] = jax.random.uniform(next(ks), (1, 1), jnp.float32,
                                  -bound2, bound2)
    return p


def model_forward(params, x_dict, edge_index_dict, edge_label_index):
    x_m, x_a = x_dict['movie'], x_dict['actor']
    n_m, n_a = x_m.shape[0], x_a.shape[0]
    nm_p, na_p = _round8(n_m), _round8(n_a)

    # lane-pad features; padded node rows / channels are zero
    xm_p = _pad2(x_m, nm_p, _C)
    xa_p = _pad2(x_a, na_p, _C)

    ei_m2a = edge_index_dict[('movie', 'to', 'actor')]
    ei_a2m = edge_index_dict[('actor', 'rev_to', 'movie')]
    a_act = dense_mean_adj(ei_m2a, nm_p, na_p)   # movie feats -> actors
    a_mov = dense_mean_adj(ei_a2m, na_p, nm_p)   # actor feats -> movies

    row, col = edge_label_index[0], edge_label_index[1]
    e = row.shape[0]
    e_p = _round8(e)
    sel_m = onehot_select(row, nm_p, e_p)
    sel_a = onehot_select(col, na_p, e_p)

    out = fused_forward(a_act, a_mov, xm_p, xa_p, params, sel_m, sel_a, e_p)
    return out[:e, 0]


# ---------------------------------------------------------------------------
# Pure-JAX reference (for self-validation only)
# ---------------------------------------------------------------------------
def _ref_forward(params, x_dict, edge_index_dict, edge_label_index,
                 hidden, f_movie, f_actor):
    hp = jax.lax.Precision.HIGHEST

    def dot(a, b):
        return jnp.dot(a, b, precision=hp)

    def unfuse(w, fi_l, fi_r):
        return w[:fi_l, :hidden], w[_C:_C + fi_r, :hidden]

    def mean_aggr(x_src, edge_index, n_dst):
        src, dst = edge_index[0], edge_index[1]
        s = jax.ops.segment_sum(x_src[src], dst, num_segments=n_dst)
        c = jax.ops.segment_sum(jnp.ones_like(src, jnp.float32), dst,
                                num_segments=n_dst)
        return s / jnp.maximum(c, 1.0)[:, None]

    def sage(x_src, x_dst, edge_index, w, b, fi_l, fi_r, relu):
        wl, wr = unfuse(w, fi_l, fi_r)
        agg = mean_aggr(x_src, edge_index, x_dst.shape[0])
        out = dot(agg, wl) + dot(x_dst, wr) + b[0, :hidden]
        return jnp.maximum(out, 0.0) if relu else out

    x_m, x_a = x_dict['movie'], x_dict['actor']
    ei_m2a = edge_index_dict[('movie', 'to', 'actor')]
    ei_a2m = edge_index_dict[('actor', 'rev_to', 'movie')]

    h_a = sage(x_m, x_a, ei_m2a, params['w1_act'], params['b1_act'],
               f_movie, f_actor, True)
    h_m = sage(x_a, x_m, ei_a2m, params['w1_mov'], params['b1_mov'],
               f_actor, f_movie, True)
    z_a = sage(h_m, h_a, ei_m2a, params['w2_act'], params['b2_act'],
               hidden, hidden, False)
    z_m = sage(h_a, h_m, ei_a2m, params['w2_mov'], params['b2_mov'],
               hidden, hidden, False)

    row, col = edge_label_index[0], edge_label_index[1]
    wd1_m, wd1_a = unfuse(params['wd1'], hidden, hidden)
    h = jnp.maximum(dot(z_m[row], wd1_m) + dot(z_a[col], wd1_a)
                    + params['bd1'][0, :hidden], 0.0)
    return dot(h, params['wd2'][0, :hidden]) + params['bd2'][0, 0]


# ---------------------------------------------------------------------------
if __name__ == "__main__":
    key = jax.random.PRNGKey(0)
    k_feat_m, k_feat_a, k_edge, k_lbl, k_param = jax.random.split(key, 5)

    hidden = 32
    n_movie, n_actor = 12, 10
    f_movie, f_actor = 24, 16
    n_edges = 40
    n_label_edges = 8

    x_dict = {
        'movie': jax.random.normal(k_feat_m, (n_movie, f_movie), jnp.float32),
        'actor': jax.random.normal(k_feat_a, (n_actor, f_actor), jnp.float32),
    }
    km1, km2 = jax.random.split(k_edge, 2)
    ei_m2a = jnp.stack([jax.random.randint(km1, (n_edges,), 0, n_movie),
                        jax.random.randint(km2, (n_edges,), 0, n_actor)])
    ei_a2m = jnp.stack([ei_m2a[1], ei_m2a[0]])   # reverse edges (to_hetero)
    edge_index_dict = {
        ('movie', 'to', 'actor'): ei_m2a,
        ('actor', 'rev_to', 'movie'): ei_a2m,
    }
    kl1, kl2 = jax.random.split(k_lbl)
    edge_label_index = jnp.stack(
        [jax.random.randint(kl1, (n_label_edges,), 0, n_movie),
         jax.random.randint(kl2, (n_label_edges,), 0, n_actor)])

    params = init_params(k_param, hidden, f_movie, f_actor)

    out = jax.jit(model_forward)(params, x_dict, edge_index_dict,
                                 edge_label_index)
    out = jax.block_until_ready(out)
    assert out.shape == (n_label_edges,) and out.dtype == jnp.float32

    ref = _ref_forward(params, x_dict, edge_index_dict, edge_label_index,
                       hidden, f_movie, f_actor)
    assert jnp.allclose(out, ref, rtol=2e-2, atol=2e-2), (out, ref)
    print("KERNEL_OK")
</pallas_src>

<mosaic_0001>
module attributes {stable_mosaic.version = 11 : i64} {
  func.func @_fused_forward_kernel(%arg0: i32, %arg1: memref<16x16xf32, #tpu.memory_space<vmem>>, %arg2: memref<16x16xf32, #tpu.memory_space<vmem>>, %arg3: memref<16x128xf32, #tpu.memory_space<vmem>>, %arg4: memref<16x128xf32, #tpu.memory_space<vmem>>, %arg5: memref<256x128xf32, #tpu.memory_space<vmem>>, %arg6: memref<1x128xf32, #tpu.memory_space<vmem>>, %arg7: memref<256x128xf32, #tpu.memory_space<vmem>>, %arg8: memref<1x128xf32, #tpu.memory_space<vmem>>, %arg9: memref<256x128xf32, #tpu.memory_space<vmem>>, %arg10: memref<1x128xf32, #tpu.memory_space<vmem>>, %arg11: memref<256x128xf32, #tpu.memory_space<vmem>>, %arg12: memref<1x128xf32, #tpu.memory_space<vmem>>, %arg13: memref<8x16xf32, #tpu.memory_space<vmem>>, %arg14: memref<8x16xf32, #tpu.memory_space<vmem>>, %arg15: memref<256x128xf32, #tpu.memory_space<vmem>>, %arg16: memref<1x128xf32, #tpu.memory_space<vmem>>, %arg17: memref<1x128xf32, #tpu.memory_space<vmem>>, %arg18: memref<1x1xf32, #tpu.memory_space<vmem>>, %arg19: memref<8x128xf32, #tpu.memory_space<vmem>>) attributes {dimension_semantics = [#tpu.dimension_semantics<arbitrary>], iteration_bounds = array<i64: 1>, scalar_prefetch = 0 : i64, scratch_operands = 0 : i64, tpu.core_type = #tpu.core_type<tc>, window_params = [{pipeline_mode = #tpu.pipeline_mode<synchronous>, transform_indices = @transform_0, window_bounds = array<i64: 16, 16>}, {pipeline_mode = #tpu.pipeline_mode<synchronous>, transform_indices = @transform_1, window_bounds = array<i64: 16, 16>}, {pipeline_mode = #tpu.pipeline_mode<synchronous>, transform_indices = @transform_2, window_bounds = array<i64: 16, 128>}, {pipeline_mode = #tpu.pipeline_mode<synchronous>, transform_indices = @transform_3, window_bounds = array<i64: 16, 128>}, {pipeline_mode = #tpu.pipeline_mode<synchronous>, transform_indices = @transform_4, window_bounds = array<i64: 256, 128>}, {pipeline_mode = #tpu.pipeline_mode<synchronous>, transform_indices = @transform_5, window_bounds = array<i64: 1, 128>}, {pipeline_mode = #tpu.pipeline_mode<synchronous>, transform_indices = @transform_6, window_bounds = array<i64: 256, 128>}, {pipeline_mode = #tpu.pipeline_mode<synchronous>, transform_indices = @transform_7, window_bounds = array<i64: 1, 128>}, {pipeline_mode = #tpu.pipeline_mode<synchronous>, transform_indices = @transform_8, window_bounds = array<i64: 256, 128>}, {pipeline_mode = #tpu.pipeline_mode<synchronous>, transform_indices = @transform_9, window_bounds = array<i64: 1, 128>}, {pipeline_mode = #tpu.pipeline_mode<synchronous>, transform_indices = @transform_10, window_bounds = array<i64: 256, 128>}, {pipeline_mode = #tpu.pipeline_mode<synchronous>, transform_indices = @transform_11, window_bounds = array<i64: 1, 128>}, {pipeline_mode = #tpu.pipeline_mode<synchronous>, transform_indices = @transform_12, window_bounds = array<i64: 8, 16>}, {pipeline_mode = #tpu.pipeline_mode<synchronous>, transform_indices = @transform_13, window_bounds = array<i64: 8, 16>}, {pipeline_mode = #tpu.pipeline_mode<synchronous>, transform_indices = @transform_14, window_bounds = array<i64: 256, 128>}, {pipeline_mode = #tpu.pipeline_mode<synchronous>, transform_indices = @transform_15, window_bounds = array<i64: 1, 128>}, {pipeline_mode = #tpu.pipeline_mode<synchronous>, transform_indices = @transform_16, window_bounds = array<i64: 1, 128>}, {pipeline_mode = #tpu.pipeline_mode<synchronous>, transform_indices = @transform_17, window_bounds = array<i64: 1, 1>}, {pipeline_mode = #tpu.pipeline_mode<synchronous>, transform_indices = @transform_18, window_bounds = array<i64: 8, 128>}]} {
    %c0 = arith.constant 0 : index
    %c0_0 = arith.constant 0 : index
    %0 = vector.load %arg3[%c0, %c0_0] : memref<16x128xf32, #tpu.memory_space<vmem>>, vector<16x128xf32>
    %c0_1 = arith.constant 0 : index
    %c0_2 = arith.constant 0 : index
    %1 = vector.load %arg4[%c0_1, %c0_2] : memref<16x128xf32, #tpu.memory_space<vmem>>, vector<16x128xf32>
    %c0_3 = arith.constant 0 : index
    %c0_4 = arith.constant 0 : index
    %2 = vector.load %arg1[%c0_3, %c0_4] : memref<16x16xf32, #tpu.memory_space<vmem>>, vector<16x16xf32>
    %c0_5 = arith.constant 0 : index
    %c0_6 = arith.constant 0 : index
    %3 = vector.load %arg2[%c0_5, %c0_6] : memref<16x16xf32, #tpu.memory_space<vmem>>, vector<16x16xf32>
    %cst = arith.constant dense<0.000000e+00> : vector<16x128xf32>
    %4 = tpu.matmul %2, %0, %cst {dimension_numbers = #tpu.dot_dimension_numbers<[1], [0], [0], [1], [0, 0, 1, 1], [], []>} : vector<16x16xf32>, vector<16x128xf32>, vector<16x128xf32> -> vector<16x128xf32>
    %c0_7 = arith.constant 0 : index
    %c0_8 = arith.constant 0 : index
    %5 = vector.load %arg5[%c0_7, %c0_8] : memref<256x128xf32, #tpu.memory_space<vmem>>, vector<128x128xf32>
    %cst_9 = arith.constant dense<0.000000e+00> : vector<16x128xf32>
    %6 = tpu.matmul %4, %5, %cst_9 {dimension_numbers = #tpu.dot_dimension_numbers<[1], [0], [0], [1], [0, 0, 1, 1], [], []>} : vector<16x128xf32>, vector<128x128xf32>, vector<16x128xf32> -> vector<16x128xf32>
    %c128 = arith.constant 128 : index
    %c0_10 = arith.constant 0 : index
    %7 = vector.load %arg5[%c128, %c0_10] : memref<256x128xf32, #tpu.memory_space<vmem>>, vector<128x128xf32>
    %cst_11 = arith.constant dense<0.000000e+00> : vector<16x128xf32>
    %8 = tpu.matmul %1, %7, %cst_11 {dimension_numbers = #tpu.dot_dimension_numbers<[1], [0], [0], [1], [0, 0, 1, 1], [], []>} : vector<16x128xf32>, vector<128x128xf32>, vector<16x128xf32> -> vector<16x128xf32>
    %9 = arith.addf %6, %8 : vector<16x128xf32>
    %c0_12 = arith.constant 0 : index
    %c0_13 = arith.constant 0 : index
    %10 = vector.load %arg6[%c0_12, %c0_13] : memref<1x128xf32, #tpu.memory_space<vmem>>, vector<1x128xf32>
    %11 = vector.broadcast %10 : vector<1x128xf32> to vector<16x128xf32>
    %12 = arith.addf %9, %11 : vector<16x128xf32>
    %cst_14 = arith.constant 0.000000e+00 : f32
    %13 = vector.broadcast %cst_14 : f32 to vector<16x128xf32>
    %14 = arith.maximumf %12, %13 : vector<16x128xf32>
    %cst_15 = arith.constant dense<0.000000e+00> : vector<16x128xf32>
    %15 = tpu.matmul %3, %1, %cst_15 {dimension_numbers = #tpu.dot_dimension_numbers<[1], [0], [0], [1], [0, 0, 1, 1], [], []>} : vector<16x16xf32>, vector<16x128xf32>, vector<16x128xf32> -> vector<16x128xf32>
    %c0_16 = arith.constant 0 : index
    %c0_17 = arith.constant 0 : index
    %16 = vector.load %arg7[%c0_16, %c0_17] : memref<256x128xf32, #tpu.memory_space<vmem>>, vector<128x128xf32>
    %cst_18 = arith.constant dense<0.000000e+00> : vector<16x128xf32>
    %17 = tpu.matmul %15, %16, %cst_18 {dimension_numbers = #tpu.dot_dimension_numbers<[1], [0], [0], [1], [0, 0, 1, 1], [], []>} : vector<16x128xf32>, vector<128x128xf32>, vector<16x128xf32> -> vector<16x128xf32>
    %c128_19 = arith.constant 128 : index
    %c0_20 = arith.constant 0 : index
    %18 = vector.load %arg7[%c128_19, %c0_20] : memref<256x128xf32, #tpu.memory_space<vmem>>, vector<128x128xf32>
    %cst_21 = arith.constant dense<0.000000e+00> : vector<16x128xf32>
    %19 = tpu.matmul %0, %18, %cst_21 {dimension_numbers = #tpu.dot_dimension_numbers<[1], [0], [0], [1], [0, 0, 1, 1], [], []>} : vector<16x128xf32>, vector<128x128xf32>, vector<16x128xf32> -> vector<16x128xf32>
    %20 = arith.addf %17, %19 : vector<16x128xf32>
    %c0_22 = arith.constant 0 : index
    %c0_23 = arith.constant 0 : index
    %21 = vector.load %arg8[%c0_22, %c0_23] : memref<1x128xf32, #tpu.memory_space<vmem>>, vector<1x128xf32>
    %22 = vector.broadcast %21 : vector<1x128xf32> to vector<16x128xf32>
    %23 = arith.addf %20, %22 : vector<16x128xf32>
    %cst_24 = arith.constant 0.000000e+00 : f32
    %24 = vector.broadcast %cst_24 : f32 to vector<16x128xf32>
    %25 = arith.maximumf %23, %24 : vector<16x128xf32>
    %cst_25 = arith.constant dense<0.000000e+00> : vector<16x128xf32>
    %26 = tpu.matmul %2, %25, %cst_25 {dimension_numbers = #tpu.dot_dimension_numbers<[1], [0], [0], [1], [0, 0, 1, 1], [], []>} : vector<16x16xf32>, vector<16x128xf32>, vector<16x128xf32> -> vector<16x128xf32>
    %c0_26 = arith.constant 0 : index
    %c0_27 = arith.constant 0 : index
    %27 = vector.load %arg9[%c0_26, %c0_27] : memref<256x128xf32, #tpu.memory_space<vmem>>, vector<128x128xf32>
    %cst_28 = arith.constant dense<0.000000e+00> : vector<16x128xf32>
    %28 = tpu.matmul %26, %27, %cst_28 {dimension_numbers = #tpu.dot_dimension_numbers<[1], [0], [0], [1], [0, 0, 1, 1], [], []>} : vector<16x128xf32>, vector<128x128xf32>, vector<16x128xf32> -> vector<16x128xf32>
    %c128_29 = arith.constant 128 : index
    %c0_30 = arith.constant 0 : index
    %29 = vector.load %arg9[%c128_29, %c0_30] : memref<256x128xf32, #tpu.memory_space<vmem>>, vector<128x128xf32>
    %cst_31 = arith.constant dense<0.000000e+00> : vector<16x128xf32>
    %30 = tpu.matmul %14, %29, %cst_31 {dimension_numbers = #tpu.dot_dimension_numbers<[1], [0], [0], [1], [0, 0, 1, 1], [], []>} : vector<16x128xf32>, vector<128x128xf32>, vector<16x128xf32> -> vector<16x128xf32>
    %31 = arith.addf %28, %30 : vector<16x128xf32>
    %c0_32 = arith.constant 0 : index
    %c0_33 = arith.constant 0 : index
    %32 = vector.load %arg10[%c0_32, %c0_33] : memref<1x128xf32, #tpu.memory_space<vmem>>, vector<1x128xf32>
    %33 = vector.broadcast %32 : vector<1x128xf32> to vector<16x128xf32>
    %34 = arith.addf %31, %33 : vector<16x128xf32>
    %cst_34 = arith.constant dense<0.000000e+00> : vector<16x128xf32>
    %35 = tpu.matmul %3, %14, %cst_34 {dimension_numbers = #tpu.dot_dimension_numbers<[1], [0], [0], [1], [0, 0, 1, 1], [], []>} : vector<16x16xf32>, vector<16x128xf32>, vector<16x128xf32> -> vector<16x128xf32>
    %c0_35 = arith.constant 0 : index
    %c0_36 = arith.constant 0 : index
    %36 = vector.load %arg11[%c0_35, %c0_36] : memref<256x128xf32, #tpu.memory_space<vmem>>, vector<128x128xf32>
    %cst_37 = arith.constant dense<0.000000e+00> : vector<16x128xf32>
    %37 = tpu.matmul %35, %36, %cst_37 {dimension_numbers = #tpu.dot_dimension_numbers<[1], [0], [0], [1], [0, 0, 1, 1], [], []>} : vector<16x128xf32>, vector<128x128xf32>, vector<16x128xf32> -> vector<16x128xf32>
    %c128_38 = arith.constant 128 : index
    %c0_39 = arith.constant 0 : index
    %38 = vector.load %arg11[%c128_38, %c0_39] : memref<256x128xf32, #tpu.memory_space<vmem>>, vector<128x128xf32>
    %cst_40 = arith.constant dense<0.000000e+00> : vector<16x128xf32>
    %39 = tpu.matmul %25, %38, %cst_40 {dimension_numbers = #tpu.dot_dimension_numbers<[1], [0], [0], [1], [0, 0, 1, 1], [], []>} : vector<16x128xf32>, vector<128x128xf32>, vector<16x128xf32> -> vector<16x128xf32>
    %40 = arith.addf %37, %39 : vector<16x128xf32>
    %c0_41 = arith.constant 0 : index
    %c0_42 = arith.constant 0 : index
    %41 = vector.load %arg12[%c0_41, %c0_42] : memref<1x128xf32, #tpu.memory_space<vmem>>, vector<1x128xf32>
    %42 = vector.broadcast %41 : vector<1x128xf32> to vector<16x128xf32>
    %43 = arith.addf %40, %42 : vector<16x128xf32>
    %c0_43 = arith.constant 0 : index
    %c0_44 = arith.constant 0 : index
    %44 = vector.load %arg13[%c0_43, %c0_44] : memref<8x16xf32, #tpu.memory_space<vmem>>, vector<8x16xf32>
    %cst_45 = arith.constant dense<0.000000e+00> : vector<8x128xf32>
    %45 = tpu.matmul %44, %43, %cst_45 {dimension_numbers = #tpu.dot_dimension_numbers<[1], [0], [0], [1], [0, 0, 1, 1], [], []>} : vector<8x16xf32>, vector<16x128xf32>, vector<8x128xf32> -> vector<8x128xf32>
    %c0_46 = arith.constant 0 : index
    %c0_47 = arith.constant 0 : index
    %46 = vector.load %arg14[%c0_46, %c0_47] : memref<8x16xf32, #tpu.memory_space<vmem>>, vector<8x16xf32>
    %cst_48 = arith.constant dense<0.000000e+00> : vector<8x128xf32>
    %47 = tpu.matmul %46, %34, %cst_48 {dimension_numbers = #tpu.dot_dimension_numbers<[1], [0], [0], [1], [0, 0, 1, 1], [], []>} : vector<8x16xf32>, vector<16x128xf32>, vector<8x128xf32> -> vector<8x128xf32>
    %c0_49 = arith.constant 0 : index
    %c0_50 = arith.constant 0 : index
    %48 = vector.load %arg15[%c0_49, %c0_50] : memref<256x128xf32, #tpu.memory_space<vmem>>, vector<128x128xf32>
    %cst_51 = arith.constant dense<0.000000e+00> : vector<8x128xf32>
    %49 = tpu.matmul %45, %48, %cst_51 {dimension_numbers = #tpu.dot_dimension_numbers<[1], [0], [0], [1], [0, 0, 1, 1], [], []>} : vector<8x128xf32>, vector<128x128xf32>, vector<8x128xf32> -> vector<8x128xf32>
    %c128_52 = arith.constant 128 : index
    %c0_53 = arith.constant 0 : index
    %50 = vector.load %arg15[%c128_52, %c0_53] : memref<256x128xf32, #tpu.memory_space<vmem>>, vector<128x128xf32>
    %cst_54 = arith.constant dense<0.000000e+00> : vector<8x128xf32>
    %51 = tpu.matmul %47, %50, %cst_54 {dimension_numbers = #tpu.dot_dimension_numbers<[1], [0], [0], [1], [0, 0, 1, 1], [], []>} : vector<8x128xf32>, vector<128x128xf32>, vector<8x128xf32> -> vector<8x128xf32>
    %52 = arith.addf %49, %51 : vector<8x128xf32>
    %c0_55 = arith.constant 0 : index
    %c0_56 = arith.constant 0 : index
    %53 = vector.load %arg16[%c0_55, %c0_56] : memref<1x128xf32, #tpu.memory_space<vmem>>, vector<1x128xf32>
    %54 = vector.broadcast %53 : vector<1x128xf32> to vector<8x128xf32>
    %55 = arith.addf %52, %54 : vector<8x128xf32>
    %cst_57 = arith.constant 0.000000e+00 : f32
    %56 = vector.broadcast %cst_57 : f32 to vector<8x128xf32>
    %57 = arith.maximumf %55, %56 : vector<8x128xf32>
    %c0_58 = arith.constant 0 : index
    %c0_59 = arith.constant 0 : index
    %58 = vector.load %arg17[%c0_58, %c0_59] : memref<1x128xf32, #tpu.memory_space<vmem>>, vector<1x128xf32>
    %59 = vector.broadcast %58 : vector<1x128xf32> to vector<8x128xf32>
    %60 = arith.mulf %57, %59 : vector<8x128xf32>
    %cst_60 = arith.constant dense<0.000000e+00> : vector<8xf32>
    %61 = vector.multi_reduction <add>, %60, %cst_60 [1] : vector<8x128xf32> to vector<8xf32>
    %62 = vector.shape_cast %61 : vector<8xf32> to vector<8x1xf32>
    %c0_61 = arith.constant 0 : index
    %c0_62 = arith.constant 0 : index
    %63 = vector.load %arg18[%c0_61, %c0_62] : memref<1x1xf32, #tpu.memory_space<vmem>>, vector<1x1xf32>
    %64 = vector.broadcast %63 : vector<1x1xf32> to vector<8x1xf32>
    %65 = arith.addf %62, %64 : vector<8x1xf32>
    %66 = vector.shape_cast %65 : vector<8x1xf32> to vector<8x1xf32>
    %67 = vector.broadcast %66 : vector<8x1xf32> to vector<8x128xf32>
    %c0_63 = arith.constant 0 : index
    %c0_64 = arith.constant 0 : index
    %68 = vector.load %arg19[%c0_63, %c0_64] : memref<8x128xf32, #tpu.memory_space<vmem>>, vector<8x128xf32>
    tpu.vector_store %arg19[%c0_63, %c0_64], %67 {strides = array<i32>} : memref<8x128xf32, #tpu.memory_space<vmem>>, vector<8x128xf32>,
    return
  }
  func.func @transform_0(%arg0: i32) -> (i32, i32) {
    %c0_i32 = arith.constant 0 : i32
    %c0_i32_0 = arith.constant 0 : i32
    %c0_i32_1 = arith.constant 0 : i32
    return %c0_i32, %c0_i32_0 : i32, i32
  }
  func.func @transform_1(%arg0: i32) -> (i32, i32) {
    %c0_i32 = arith.constant 0 : i32
    %c0_i32_0 = arith.constant 0 : i32
    %c0_i32_1 = arith.constant 0 : i32
    return %c0_i32, %c0_i32_0 : i32, i32
  }
  func.func @transform_2(%arg0: i32) -> (i32, i32) {
    %c0_i32 = arith.constant 0 : i32
    %c0_i32_0 = arith.constant 0 : i32
    %c0_i32_1 = arith.constant 0 : i32
    return %c0_i32, %c0_i32_0 : i32, i32
  }
  func.func @transform_3(%arg0: i32) -> (i32, i32) {
    %c0_i32 = arith.constant 0 : i32
    %c0_i32_0 = arith.constant 0 : i32
    %c0_i32_1 = arith.constant 0 : i32
    return %c0_i32, %c0_i32_0 : i32, i32
  }
  func.func @transform_4(%arg0: i32) -> (i32, i32) {
    %c0_i32 = arith.constant 0 : i32
    %c0_i32_0 = arith.constant 0 : i32
    %c0_i32_1 = arith.constant 0 : i32
    return %c0_i32, %c0_i32_0 : i32, i32
  }
  func.func @transform_5(%arg0: i32) -> (i32, i32) {
    %c0_i32 = arith.constant 0 : i32
    %c0_i32_0 = arith.constant 0 : i32
    %c0_i32_1 = arith.constant 0 : i32
    return %c0_i32, %c0_i32_0 : i32, i32
  }
  func.func @transform_6(%arg0: i32) -> (i32, i32) {
    %c0_i32 = arith.constant 0 : i32
    %c0_i32_0 = arith.constant 0 : i32
    %c0_i32_1 = arith.constant 0 : i32
    return %c0_i32, %c0_i32_0 : i32, i32
  }
  func.func @transform_7(%arg0: i32) -> (i32, i32) {
    %c0_i32 = arith.constant 0 : i32
    %c0_i32_0 = arith.constant 0 : i32
    %c0_i32_1 = arith.constant 0 : i32
    return %c0_i32, %c0_i32_0 : i32, i32
  }
  func.func @transform_8(%arg0: i32) -> (i32, i32) {
    %c0_i32 = arith.constant 0 : i32
    %c0_i32_0 = arith.constant 0 : i32
    %c0_i32_1 = arith.constant 0 : i32
    return %c0_i32, %c0_i32_0 : i32, i32
  }
  func.func @transform_9(%arg0: i32) -> (i32, i32) {
    %c0_i32 = arith.constant 0 : i32
    %c0_i32_0 = arith.constant 0 : i32
    %c0_i32_1 = arith.constant 0 : i32
    return %c0_i32, %c0_i32_0 : i32, i32
  }
  func.func @transform_10(%arg0: i32) -> (i32, i32) {
    %c0_i32 = arith.constant 0 : i32
    %c0_i32_0 = arith.constant 0 : i32
    %c0_i32_1 = arith.constant 0 : i32
    return %c0_i32, %c0_i32_0 : i32, i32
  }
  func.func @transform_11(%arg0: i32) -> (i32, i32) {
    %c0_i32 = arith.constant 0 : i32
    %c0_i32_0 = arith.constant 0 : i32
    %c0_i32_1 = arith.constant 0 : i32
    return %c0_i32, %c0_i32_0 : i32, i32
  }
  func.func @transform_12(%arg0: i32) -> (i32, i32) {
    %c0_i32 = arith.constant 0 : i32
    %c0_i32_0 = arith.constant 0 : i32
    %c0_i32_1 = arith.constant 0 : i32
    return %c0_i32, %c0_i32_0 : i32, i32
  }
  func.func @transform_13(%arg0: i32) -> (i32, i32) {
    %c0_i32 = arith.constant 0 : i32
    %c0_i32_0 = arith.constant 0 : i32
    %c0_i32_1 = arith.constant 0 : i32
    return %c0_i32, %c0_i32_0 : i32, i32
  }
  func.func @transform_14(%arg0: i32) -> (i32, i32) {
    %c0_i32 = arith.constant 0 : i32
    %c0_i32_0 = arith.constant 0 : i32
    %c0_i32_1 = arith.constant 0 : i32
    return %c0_i32, %c0_i32_0 : i32, i32
  }
  func.func @transform_15(%arg0: i32) -> (i32, i32) {
    %c0_i32 = arith.constant 0 : i32
    %c0_i32_0 = arith.constant 0 : i32
    %c0_i32_1 = arith.constant 0 : i32
    return %c0_i32, %c0_i32_0 : i32, i32
  }
  func.func @transform_16(%arg0: i32) -> (i32, i32) {
    %c0_i32 = arith.constant 0 : i32
    %c0_i32_0 = arith.constant 0 : i32
    %c0_i32_1 = arith.constant 0 : i32
    return %c0_i32, %c0_i32_0 : i32, i32
  }
  func.func @transform_17(%arg0: i32) -> (i32, i32) {
    %c0_i32 = arith.constant 0 : i32
    %c0_i32_0 = arith.constant 0 : i32
    %c0_i32_1 = arith.constant 0 : i32
    return %c0_i32, %c0_i32_0 : i32, i32
  }
  func.func @transform_18(%arg0: i32) -> (i32, i32) {
    %c0_i32 = arith.constant 0 : i32
    %c0_i32_0 = arith.constant 0 : i32
    %c0_i32_1 = arith.constant 0 : i32
    return %c0_i32, %c0_i32_0 : i32, i32
  }
}

</mosaic_0001>

<bundles_post_ra>
// kernel: model_forward.1
= control target key start
LH: loop header
LB: loop body
LE: loop exit
PB: predicated region body
PF: predicated region fallthrough
CT: control target
= control target key end

     0   :  { %s3362_s0 = inlined_call_operand.vmem [shape: f32[16,16], index: 0, kind: input, shape index: {}]   ;;  %s3363_s1 = inlined_call_operand.vmem [shape: f32[16,16], index: 1, kind: input, shape index: {}]   ;;  %s3364_s2 = inlined_call_operand.vmem [shape: f32[16,128], index: 2, kind: input, shape index: {}]   ;;  %s3365_s3 = inlined_call_operand.vmem [shape: f32[16,128], index: 3, kind: input, shape index: {}]   ;;  %s3366_s4 = inlined_call_operand.vmem [shape: f32[256,128], index: 4, kind: input, shape index: {}]   ;;  %s3367_s5 = inlined_call_operand.vmem [shape: f32[1,128], index: 5, kind: input, shape index: {}]   ;;  %s3368_s6 = inlined_call_operand.vmem [shape: f32[256,128], index: 6, kind: input, shape index: {}]   ;;  %s3369_s7 = inlined_call_operand.hbm [shape: f32[1,128], index: 7, kind: input, shape index: {}]   ;;  %s3370_s8 = inlined_call_operand.vmem [shape: f32[256,128], index: 8, kind: input, shape index: {}]   ;;  %s3371_s9 = inlined_call_operand.hbm [shape: f32[1,128], index: 9, kind: input, shape index: {}]   ;;  %s3372_s10 = inlined_call_operand.vmem [shape: f32[256,128], index: 10, kind: input, shape index: {}]   ;;  %s3373_s11 = inlined_call_operand.hbm [shape: f32[1,128], index: 11, kind: input, shape index: {}]   ;;  %s3374_s12 = inlined_call_operand.vmem [shape: f32[8,16], index: 12, kind: input, shape index: {}]   ;;  %s3375_s13 = inlined_call_operand.vmem [shape: f32[8,16], index: 13, kind: input, shape index: {}]   ;;  %s3376_s14 = inlined_call_operand.hbm [shape: f32[256,128], index: 14, kind: input, shape index: {}]   ;;  %s3377_s15 = inlined_call_operand.hbm [shape: f32[1,128], index: 15, kind: input, shape index: {}]   ;;  %s3378_s16 = inlined_call_operand.hbm [shape: f32[1,128], index: 16, kind: input, shape index: {}]   ;;  %s3379_s17 = inlined_call_operand.<no memory space> [shape: f32[1,1], index: 17, kind: input, shape index: {}]   ;;  %s3380_s18 = inlined_call_operand.vmem [shape: f32[8,128], index: 18, kind: output, shape index: {}]  }
   0x1   :  { %3384 = sst [smem:[#allocation17_spill]] %s3362_s0  ;;  %v23_v0 = vstv %s3379_s17 }
   0x2   :  { %3385 = sst [smem:[#allocation18_spill]] %s3363_s1  ;;  %24 = vst [vmem:[#allocation2] sm:$0x1] %v23_v0 }
   0x3   :  { %3386 = sst [smem:[#allocation19_spill]] %s3364_s2 }
   0x4   :  { %25 = vsyncpa [#allocation4], 0 }
   0x5   :  { %26 = vsyncpa [#allocation6], 0 }
   0x6   :  { %27 = vsyncpa [#allocation9], 0 }
   0x7   :  { %28 = vsyncpa [#allocation12], 0  ;;  %s2679_s29 = smov [#allocation5]   ;;  %s2680_s0 = smov [#allocation8]  }
   0x8   :  { %s61_s30 = sshll.u32 %s2679_s29, 4  ;;  %s86_s19 = sshll.u32 %s2680_s0, 4  ;;  %s62_s30 = int_to_ptr.vmem [resolvable:$true] %s61_s30  ;;  %s2789_s19 = int_to_ptr.vmem [resolvable:$true] %s86_s19 }
   0x9   :  { %s2539_s21 = scalar_lea.hbm %s3371_s9, 16 }
   0xa   :  { %p2540_p0 = scmp.ne.s32.totalorder %s3371_s9, %s2539_s21  ;;  %p2543_p1 = scmp.lt.u32.totalorder %s2539_s21, %s3371_s9 }
   0xc   :  { %p2545_p2 = pnand %p2543_p1, %p2540_p0 }
   0xe   :  { %2548 = shalt.err (!%p2545_p2)
}
   0xf   :  { %s2549_s24 = scalar_lea.vmem %s62_s30, 16  ;;  %s2553_s25 = scalar_lea.vmem %s62_s30, 32 }
  0x10   :  { %p2550_p3 = scmp.ne.s32.totalorder %s62_s30, %s2549_s24  ;;  %p2554_p4 = scmp.lt.s32.totalorder %s62_s30, %s62_s30 }
  0x11   :  { %p2555_p5 = scmp.lt.s32.totalorder %s2553_s25, %s2549_s24 }
  0x13   :  { %p2556_p6 = por %p2555_p5, %p2554_p4 }
  0x15   :  { %p2557_p7 = pnand %p2556_p6, %p2550_p3 }
  0x17   :  { %2560 = shalt.err (!%p2557_p7)
}
  0x18   :  { %64 = dma.hbm_to_vmem [thread:$0]  %s3371_s9, 16, %s62_s30, [#allocation6]  }
  0x19   :  { %s2561_s0 = scalar_lea.hbm %s3376_s14, 4096 }
  0x1a   :  { %p2562_p8 = scmp.ne.s32.totalorder %s3376_s14, %s2561_s0  ;;  %p2565_p9 = scmp.lt.u32.totalorder %s2561_s0, %s3376_s14 }
  0x1c   :  { %p2567_p10 = pnand %p2565_p9, %p2562_p8 }
  0x1e   :  { %2570 = shalt.err (!%p2567_p10)
}
  0x1f   :  { %s2571_s2 = scalar_lea.vmem %s2789_s19, 4096  ;;  %p2576_p12 = scmp.lt.s32.totalorder %s2789_s19, %s2789_s19 }
  0x20   :  { %p2572_p11 = scmp.ne.s32.totalorder %s2789_s19, %s2571_s2  ;;  %p2577_p13 = scmp.lt.s32.totalorder %s2571_s2, %s2571_s2 }
  0x22   :  { %p2578_p0 = por %p2577_p13, %p2576_p12 }
  0x24   :  { %p2579_p1 = pnand %p2578_p0, %p2572_p11 }
  0x26   :  { %2582 = shalt.err (!%p2579_p1)
}
  0x27   :  { %s2681_s9 = smov 128   ;;  %s2682_s30 = smov 8  }
  0x28   :  { %92 = dma.hbm_to_vmem [thread:$0]  %s3376_s14, 4096, %s2789_s19, [#allocation9], %s2681_s9, %s2681_s9, %s2682_s30  }
  0x29   :  { %s2683_s24 = smov [#allocation3]   ;;  %s2684_s26 = smov [#allocation7]  }
  0x2a   :  { %s49_s25 = sshll.u32 %s2683_s24, 4  ;;  %s73_s27 = sshll.u32 %s2684_s26, 4  ;;  %s50_s25 = int_to_ptr.vmem [resolvable:$true] %s49_s25  ;;  %s74_s27 = int_to_ptr.vmem [resolvable:$true] %s73_s27 }
  0x2b   :  { %s2583_s0 = scalar_lea.hbm %s3369_s7, 16 }
  0x2c   :  { %p2584_p2 = scmp.ne.s32.totalorder %s3369_s7, %s2583_s0  ;;  %p2587_p3 = scmp.lt.u32.totalorder %s2583_s0, %s3369_s7 }
  0x2e   :  { %p2589_p4 = pnand %p2587_p3, %p2584_p2 }
  0x30   :  { %2592 = shalt.err (!%p2589_p4)
}
  0x31   :  { %s2593_s14 = scalar_lea.vmem %s50_s25, 16  ;;  %s2597_s19 = scalar_lea.vmem %s50_s25, 32 }
  0x32   :  { %p2594_p5 = scmp.ne.s32.totalorder %s50_s25, %s2593_s14  ;;  %p2598_p6 = scmp.lt.s32.totalorder %s50_s25, %s50_s25 }
  0x33   :  { %p2599_p7 = scmp.lt.s32.totalorder %s2597_s19, %s2593_s14 }
  0x35   :  { %p2600_p8 = por %p2599_p7, %p2598_p6 }
  0x37   :  { %p2601_p9 = pnand %p2600_p8, %p2594_p5 }
  0x39   :  { %2604 = shalt.err (!%p2601_p9)
}
  0x3a   :  { %52 = dma.hbm_to_vmem [thread:$0]  %s3369_s7, 16, %s50_s25, [#allocation4]  }
  0x3b   :  { %s2605_s23 = scalar_lea.hbm %s3373_s11, 16 }
  0x3c   :  { %p2606_p10 = scmp.ne.s32.totalorder %s3373_s11, %s2605_s23  ;;  %p2609_p11 = scmp.lt.u32.totalorder %s2605_s23, %s3373_s11 }
  0x3e   :  { %p2611_p12 = pnand %p2609_p11, %p2606_p10 }
  0x40   :  { %2614 = shalt.err (!%p2611_p12)
}
  0x41   :  { %s2615_s0 = scalar_lea.vmem %s74_s27, 16  ;;  %s2619_s1 = scalar_lea.vmem %s74_s27, 32 }
  0x42   :  { %p2616_p13 = scmp.ne.s32.totalorder %s74_s27, %s2615_s0  ;;  %p2620_p0 = scmp.lt.s32.totalorder %s74_s27, %s74_s27 }
  0x43   :  { %p2621_p1 = scmp.lt.s32.totalorder %s2619_s1, %s2615_s0 }
  0x45   :  { %p2622_p2 = por %p2621_p1, %p2620_p0 }
  0x47   :  { %p2623_p3 = pnand %p2622_p2, %p2616_p13 }
  0x49   :  { %2626 = shalt.err (!%p2623_p3)
}
  0x4a   :  { %76 = dma.hbm_to_vmem [thread:$0]  %s3373_s11, 16, %s74_s27, [#allocation6]  }
  0x4b   :  { %s2685_s20 = smov [#allocation10]   ;;  %s2686_s22 = smov [#allocation11]  }
  0x4c   :  { %s99_s21 = sshll.u32 %s2685_s20, 4  ;;  %s109_s14 = sshll.u32 %s2686_s22, 4  ;;  %s100_s21 = int_to_ptr.vmem [resolvable:$true] %s99_s21  ;;  %s110_s14 = int_to_ptr.vmem [resolvable:$true] %s109_s14 }
  0x4d   :  { %s2627_s9 = scalar_lea.hbm %s3377_s15, 16 }
  0x4e   :  { %p2628_p4 = scmp.ne.s32.totalorder %s3377_s15, %s2627_s9  ;;  %p2631_p5 = scmp.lt.u32.totalorder %s2627_s9, %s3377_s15 }
  0x50   :  { %p2633_p6 = pnand %p2631_p5, %p2628_p4 }
  0x52   :  { %2636 = shalt.err (!%p2633_p6)
}
  0x53   :  { %s2637_s11 = scalar_lea.vmem %s100_s21, 16  ;;  %s2641_s27 = scalar_lea.vmem %s100_s21, 32 }
  0x54   :  { %p2638_p7 = scmp.ne.s32.totalorder %s100_s21, %s2637_s11  ;;  %p2642_p8 = scmp.lt.s32.totalorder %s100_s21, %s100_s21 }
  0x55   :  { %p2643_p9 = scmp.lt.s32.totalorder %s2641_s27, %s2637_s11 }
  0x57   :  { %p2644_p10 = por %p2643_p9, %p2642_p8 }
  0x59   :  { %p2645_p11 = pnand %p2644_p10, %p2638_p7 }
  0x5b   :  { %2648 = shalt.err (!%p2645_p11)
}
  0x5c   :  { %102 = dma.hbm_to_vmem [thread:$0]  %s3377_s15, 16, %s100_s21, [#allocation9]  }
  0x5d   :  { %s2649_s1 = scalar_lea.hbm %s3378_s16, 16 }
  0x5e   :  { %p2650_p12 = scmp.ne.s32.totalorder %s3378_s16, %s2649_s1  ;;  %p2653_p13 = scmp.lt.u32.totalorder %s2649_s1, %s3378_s16 }
  0x60   :  { %p2655_p0 = pnand %p2653_p13, %p2650_p12 }
  0x62   :  { %2658 = shalt.err (!%p2655_p0)
}
  0x63   :  { %s2659_s19 = scalar_lea.vmem %s110_s14, 16  ;;  %s2663_s2 = scalar_lea.vmem %s110_s14, 32 }
  0x64   :  { %p2660_p1 = scmp.ne.s32.totalorder %s110_s14, %s2659_s19  ;;  %p2664_p2 = scmp.lt.s32.totalorder %s110_s14, %s110_s14 }
  0x65   :  { %p2665_p3 = scmp.lt.s32.totalorder %s2663_s2, %s2659_s19 }
  0x67   :  { %p2666_p4 = por %p2665_p3, %p2664_p2 }
  0x69   :  { %p2667_p5 = pnand %p2666_p4, %p2660_p1 }
  0x6b   :  { %2670 = shalt.err (!%p2667_p5)
}
  0x6c   :  { %112 = dma.hbm_to_vmem [thread:$0]  %s3378_s16, 16, %s110_s14, [#allocation12]  }
  0x6d   :  { %2671 = dma.done.wait [#allocation4], 16  }
  0x6e   :  { %2672 = vsyncadd [#allocation4], 4294967280 }
  0x6f   :  { %2673 = dma.done.wait [#allocation6], 32  }
  0x70   :  { %2674 = vsyncadd [#allocation6], 4294967264 }
  0x71   :  { %2675 = dma.done.wait [#allocation9], 4112  }
  0x72   :  { %2676 = vsyncadd [#allocation9], 4294963184 }
  0x73   :  { %2677 = dma.done.wait [#allocation12], 16  }
  0x74   :  { %2678 = vsyncadd [#allocation12], 4294967280  ;;  %vm141_vm0 = vcmask 130048   ;;  %s3387_s17 = sld [smem:[#allocation19_spill]]  ;;  %s3388_s14 = sld [smem:[#allocation17_spill]]  ;;  %v135_v5 = vld [vmem:[%s3365_s3] sm:$0xff] }
  0x75   :  { %v2890_v6 = vld [vmem:[%s3365_s3 + $0x8] sm:$0xff]  ;;  %v239_v8 = vld [vmem:[%s3366_s4 + $0x80] sm:$0xff]  ;;  %1839 = vmatprep.mubr.f32.mxu1 %v135_v5  ;;  %v241_v10 = vld [vmem:[%s3366_s4 + $0x90] sm:$0xff]  ;;  %s3389_s11 = sld [smem:[#allocation18_spill]]  ;;  %vm2688_vm1 = vmmov 0  }
  0x76   :  { %v2260_v7 = vpack.c.bf16 %v2890_v6, %v135_v5  ;;  %v240_v9 = vld [vmem:[%s3366_s4 + $0x88] sm:$0xff]  ;;  %v242_v11 = vld [vmem:[%s3366_s4 + $0x98] sm:$0xff]  ;;  %v513_v14 = vld [vmem:[%s3368_s6 + $0x80] sm:$0xff] }
  0x77   :  { %v2196_v13 = vpack.c.bf16 %v240_v9, %v239_v8  ;;  %v514_v15 = vld [vmem:[%s3368_s6 + $0x88] sm:$0xff]  ;;  %v2200_v17 = vpack.c.bf16 %v242_v11, %v241_v10  ;;  %v243_v19 = vld [vmem:[%s3366_s4 + $0xa0] sm:$0xff]  ;;  %v515_v21 = vld [vmem:[%s3368_s6 + $0x90] sm:$0xff] }
  0x78   :  { %v2264_v18 = vpack.c.bf16 %v514_v15, %v513_v14  ;;  %v244_v20 = vld [vmem:[%s3366_s4 + $0xa8] sm:$0xff]  ;;  %v516_v22 = vld [vmem:[%s3368_s6 + $0x98] sm:$0xff]  ;;  %v245_v26 = vld [vmem:[%s3366_s4 + $0xb0] sm:$0xff] }
  0x79   :  { %2197 = vmatprep.subr.bf16.mxu1 %v2196_v13  ;;  %v2204_v24 = vpack.c.bf16 %v244_v20, %v243_v19  ;;  %v2268_v25 = vpack.c.bf16 %v516_v22, %v515_v21  ;;  %v246_v27 = vld [vmem:[%s3366_s4 + $0xb8] sm:$0xff]  ;;  %v517_v28 = vld [vmem:[%s3368_s6 + $0xa0] sm:$0xff]  ;;  %v518_v29 = vld [vmem:[%s3368_s6 + $0xa8] sm:$0xff] }
  0x7a   :  { %v133_v1 = vld [vmem:[%s3387_s17] sm:$0xff]  ;;  %v2874_v2 = vld [vmem:[%s3387_s17 + $0x8] sm:$0xff]  ;;  %2199 = vmatpush3.bf16.msra.mxu1 %v2196_v13  ;;  %v2208_v30 = vpack.c.bf16 %v246_v27, %v245_v26  ;;  %v2272_v31 = vpack.c.bf16 %v518_v29, %v517_v28  ;;  %v519_v34 = vld [vmem:[%s3368_s6 + $0xb0] sm:$0xff] }
  0x7b   :  { %v2879_v3 = vld [vmem:[%s3388_s14] sm:$0xff]  ;;  %v2192_v4 = vpack.c.bf16 %v2874_v2, %v133_v1  ;;  %v2908_v12 = vld [vmem:[%s3388_s14 + $0x8] sm:$0xff]  ;;  %2201 = vmatprep.subr.bf16.mxu1 %v2200_v17  ;;  %v520_v35 = vld [vmem:[%s3368_s6 + $0xb8] sm:$0xff] }
  0x7c   :  { %1804 = vmatprep.mubr.msk.f32.mxu0 %vm141_vm0, %v2879_v3  ;;  %v2919_v16 = vld [vmem:[%s3389_s11] sm:$0xff]  ;;  %v2940_v23 = vld [vmem:[%s3389_s11 + $0x8] sm:$0xff]  ;;  %v2276_v37 = vpack.c.bf16 %v520_v35, %v519_v34  ;;  %v249_v38 = vld [vmem:[%s3366_s4 + $0xd0] sm:$0xff] }
  0x7d   :  { %2193 = vmatprep.subr.bf16.mxu0 %v2192_v4  ;;  %v247_v32 = vld [vmem:[%s3366_s4 + $0xc0] sm:$0xff]  ;;  %v248_v33 = vld [vmem:[%s3366_s4 + $0xc8] sm:$0xff]  ;;  %v250_v39 = vld [vmem:[%s3366_s4 + $0xd8] sm:$0xff] }
  0x7e   :  { %2195 = vmatpush3.bf16.msra.mxu0 %v2192_v4  ;;  %2203 = vmatpush3.bf16.msra.mxu1 %v2200_v17  ;;  %v2212_v36 = vpack.c.bf16 %v248_v33, %v247_v32  ;;  %v521_v40 = vld [vmem:[%s3368_s6 + $0xc0] sm:$0xff]  ;;  %v522_v41 = vld [vmem:[%s3368_s6 + $0xc8] sm:$0xff]  ;;  %v2216_v42 = vpack.c.bf16 %v250_v39, %v249_v38  ;;  %v523_v46 = vld [vmem:[%s3368_s6 + $0xd0] sm:$0xff] }
  0x7f   :  { %2261 = vmatprep.subr.bf16.mxu0 %v2260_v7  ;;  %2205 = vmatprep.subr.bf16.mxu1 %v2204_v24  ;;  %v2280_v43 = vpack.c.bf16 %v522_v41, %v521_v40  ;;  %v251_v44 = vld [vmem:[%s3366_s4 + $0xe0] sm:$0xff]  ;;  %v252_v45 = vld [vmem:[%s3366_s4 + $0xe8] sm:$0xff]  ;;  %v524_v47 = vld [vmem:[%s3368_s6 + $0xd8] sm:$0xff] }
  0x80   :  { %v2220_v48 = vpack.c.bf16 %v252_v45, %v251_v44  ;;  %v2284_v49 = vpack.c.bf16 %v524_v47, %v523_v46  ;;  %v253_v50 = vld [vmem:[%s3366_s4 + $0xf0] sm:$0xff]  ;;  %v254_v51 = vld [vmem:[%s3366_s4 + $0xf8] sm:$0xff]  ;;  %v525_v52 = vld [vmem:[%s3368_s6 + $0xe0] sm:$0xff] }
  0x81   :  { %1805 = vmatmul.mubr.msk.f32.vlgmr.msra.gmra.mrb[0].mxu0 %vm141_vm0, %v2908_v12  ;;  %v526_v53 = vld [vmem:[%s3368_s6 + $0xe8] sm:$0xff]  ;;  %v2224_v54 = vpack.c.bf16 %v254_v51, %v253_v50  ;;  %v223_v56 = vld [vmem:[%s3366_s4] sm:$0xff]  ;;  %v527_v58 = vld [vmem:[%s3368_s6 + $0xf0] sm:$0xff] }
  0x82   :  { %2263 = vmatpush3.bf16.msra.mxu0 %v2260_v7  ;;  %1881 = vmatprep.mubr.msk.f32.mxu0 %vm141_vm0, %v2919_v16  ;;  %v2288_v55 = vpack.c.bf16 %v526_v53, %v525_v52  ;;  %v224_v57 = vld [vmem:[%s3366_s4 + $0x8] sm:$0xff]  ;;  %v528_v59 = vld [vmem:[%s3368_s6 + $0xf8] sm:$0xff]  ;;  %v225_v62 = vld [vmem:[%s3366_s4 + $0x10] sm:$0xff] }
  0x83   :  { %2265 = vmatprep.subr.bf16.mxu0 %v2264_v18  ;;  %2207 = vmatpush3.bf16.msra.mxu1 %v2204_v24  ;;  %v2228_v60 = vpack.c.bf16 %v224_v57, %v223_v56  ;;  %v2292_v61 = vpack.c.bf16 %v528_v59, %v527_v58  ;;  %v226_v63 = vld [vmem:[%s3366_s4 + $0x18] sm:$0xff]  ;;  %v497_v0 = vld [vmem:[%s3368_s6] sm:$0xff]  ;;  %v228_v8 = vld [vmem:[%s3366_s4 + $0x28] sm:$0xff] }
  0x84   :  { %2209 = vmatprep.subr.bf16.mxu1 %v2208_v30  ;;  %v2232_v4 = vpack.c.bf16 %v226_v63, %v225_v62  ;;  %v227_v7 = vld [vmem:[%s3366_s4 + $0x20] sm:$0xff]  ;;  %v499_v9 = vld [vmem:[%s3368_s6 + $0x10] sm:$0xff]  ;;  %v500_v10 = vld [vmem:[%s3368_s6 + $0x18] sm:$0xff] }
  0x85   :  { %1882 = vmatmul.mubr.msk.f32.vlgmr.msra.gmra.mrb[2].mxu0 %vm141_vm0, %v2940_v23  ;;  %v2236_v11 = vpack.c.bf16 %v228_v8, %v227_v7  ;;  %v2300_v13 = vpack.c.bf16 %v500_v10, %v499_v9  ;;  %v229_v14 = vld [vmem:[%s3366_s4 + $0x30] sm:$0xff]  ;;  %v501_v15 = vld [vmem:[%s3368_s6 + $0x20] sm:$0xff]  ;;  %v502_v17 = vld [vmem:[%s3368_s6 + $0x28] sm:$0xff] }
  0x86   :  { %2267 = vmatpush3.bf16.msra.mxu0 %v2264_v18  ;;  %1916 = vmatprep.mubr.f32.mxu0 %v133_v1  ;;  %v498_v1 = vld [vmem:[%s3368_s6 + $0x8] sm:$0xff]  ;;  %v2304_v19 = vpack.c.bf16 %v502_v17, %v501_v15  ;;  %v231_v20 = vld [vmem:[%s3366_s4 + $0x40] sm:$0xff]  ;;  %v503_v22 = vld [vmem:[%s3368_s6 + $0x30] sm:$0xff] }
  0x87   :  { %2269 = vmatprep.subr.bf16.mxu0 %v2268_v25  ;;  %2211 = vmatpush3.bf16.msra.mxu1 %v2208_v30  ;;  %v2296_v5 = vpack.c.bf16 %v498_v1, %v497_v0  ;;  %v232_v21 = vld [vmem:[%s3366_s4 + $0x48] sm:$0xff]  ;;  %v233_v26 = vld [vmem:[%s3366_s4 + $0x50] sm:$0xff]  ;;  %v234_v27 = vld [vmem:[%s3366_s4 + $0x58] sm:$0xff] }
  0x88   :  { %2213 = vmatprep.subr.bf16.mxu1 %v2212_v36  ;;  %v2244_v24 = vpack.c.bf16 %v232_v21, %v231_v20  ;;  %v505_v28 = vld [vmem:[%s3368_s6 + $0x40] sm:$0xff]  ;;  %v506_v29 = vld [vmem:[%s3368_s6 + $0x48] sm:$0xff]  ;;  %v2248_v30 = vpack.c.bf16 %v234_v27, %v233_v26  ;;  %v507_v34 = vld [vmem:[%s3368_s6 + $0x50] sm:$0xff] }
  0x89   :  { %v235_v32 = vld [vmem:[%s3366_s4 + $0x60] sm:$0xff]  ;;  %v236_v33 = vld [vmem:[%s3366_s4 + $0x68] sm:$0xff]  ;;  %v508_v35 = vld [vmem:[%s3368_s6 + $0x58] sm:$0xff] }
  0x8a   :  { %2271 = vmatpush3.bf16.msra.mxu0 %v2268_v25  ;;  %v237_v38 = vld [vmem:[%s3366_s4 + $0x70] sm:$0xff]  ;;  %v238_v39 = vld [vmem:[%s3366_s4 + $0x78] sm:$0xff]  ;;  %v509_v40 = vld [vmem:[%s3368_s6 + $0x60] sm:$0xff] }
  0x8b   :  { %2273 = vmatprep.subr.bf16.mxu0 %v2272_v31  ;;  %2215 = vmatpush3.bf16.msra.mxu1 %v2212_v36  ;;  %v2252_v36 = vpack.c.bf16 %v236_v33, %v235_v32  ;;  %v510_v41 = vld [vmem:[%s3368_s6 + $0x68] sm:$0xff]  ;;  %v511_v44 = vld [vmem:[%s3368_s6 + $0x70] sm:$0xff]  ;;  %v512_v45 = vld [vmem:[%s3368_s6 + $0x78] sm:$0xff] }
  0x8c   :  { %2217 = vmatprep.subr.bf16.mxu1 %v2216_v42  ;;  %v2324_v46 = vpack.c.bf16 %v512_v45, %v511_v44  ;;  %v1585_v51 = vld [vmem:[%s3367_s5] ss:$0 sm:$0xff]  ;;  %v1588_v56 = vld [vmem:[#allocation3] ss:$0 sm:$0xff]  ;;  %v1049_v8 = vld [vmem:[%s3372_s10 + $0x90] sm:$0xff] }
  0x8d   :  { %v1050_v9 = vld [vmem:[%s3372_s10 + $0x98] sm:$0xff]  ;;  %v1051_v15 = vld [vmem:[%s3372_s10 + $0xa0] sm:$0xff]  ;;  %v1052_v17 = vld [vmem:[%s3372_s10 + $0xa8] sm:$0xff] }
  0x8e   :  { %2275 = vmatpush3.bf16.msra.mxu0 %v2272_v31  ;;  %v2312_v31 = vpack.c.bf16 %v506_v29, %v505_v28  ;;  %v785_v20 = vld [vmem:[%s3370_s8 + $0xa0] sm:$0xff]  ;;  %v1053_v21 = vld [vmem:[%s3372_s10 + $0xb0] sm:$0xff]  ;;  %v1056_v27 = vld [vmem:[%s3372_s10 + $0xc8] sm:$0xff] }
  0x8f   :  { %2277 = vmatprep.subr.bf16.mxu0 %v2276_v37  ;;  %2219 = vmatpush3.bf16.msra.mxu1 %v2216_v42  ;;  %v2256_v42 = vpack.c.bf16 %v238_v39, %v237_v38  ;;  %v1055_v26 = vld [vmem:[%s3372_s10 + $0xc0] sm:$0xff]  ;;  %v1057_v32 = vld [vmem:[%s3372_s10 + $0xd0] sm:$0xff]  ;;  %v1058_v33 = vld [vmem:[%s3372_s10 + $0xd8] sm:$0xff] }
  0x90   :  { %2221 = vmatprep.subr.bf16.mxu1 %v2220_v48  ;;  %v2416_v29 = vpack.c.bf16 %v1056_v27, %v1055_v26  ;;  %v1059_v38 = vld [vmem:[%s3372_s10 + $0xe0] sm:$0xff]  ;;  %v1060_v39 = vld [vmem:[%s3372_s10 + $0xe8] sm:$0xff]  ;;  %v1061_v44 = vld [vmem:[%s3372_s10 + $0xf0] sm:$0xff] }
  0x91   :  { %v1062_v45 = vld [vmem:[%s3372_s10 + $0xf8] sm:$0xff]  ;;  %v777_v26 = vld [vmem:[%s3370_s8 + $0x60] sm:$0xff]  ;;  %v778_v27 = vld [vmem:[%s3370_s8 + $0x68] sm:$0xff] }
  0x92   :  { %2279 = vmatpush3.bf16.msra.mxu0 %v2276_v37  ;;  %v2316_v37 = vpack.c.bf16 %v508_v35, %v507_v34  ;;  %v2420_v35 = vpack.c.bf16 %v1058_v33, %v1057_v32  ;;  %v779_v32 = vld [vmem:[%s3370_s8 + $0x70] sm:$0xff]  ;;  %v780_v33 = vld [vmem:[%s3370_s8 + $0x78] sm:$0xff] }
  0x93   :  { %2281 = vmatprep.subr.bf16.mxu0 %v2280_v43  ;;  %2223 = vmatpush3.bf16.msra.mxu1 %v2220_v48 }
  0x94   :  { %2225 = vmatprep.subr.bf16.mxu1 %v2224_v54 }
  0x96   :  { %2283 = vmatpush3.bf16.msra.mxu0 %v2280_v43  ;;  %v2320_v43 = vpack.c.bf16 %v510_v41, %v509_v40  ;;  %v2424_v41 = vpack.c.bf16 %v1060_v39, %v1059_v38  ;;  %v2687_v39 = vmov 0.0|0.0  }
  0x97   :  { %2285 = vmatprep.subr.bf16.mxu0 %v2284_v49  ;;  %2227 = vmatpush3.bf16.msra.mxu1 %v2224_v54 }
  0x98   :  { %2229 = vmatprep.subr.bf16.mxu1 %v2228_v60 }
  0x9a   :  { %2287 = vmatpush3.bf16.msra.mxu0 %v2284_v49  ;;  %1840 = vmatmul.mubr.f32.vlgmr.msra.gmra.mrb[0].mxu1 %v2890_v6  ;;  %v230_v6 = vld [vmem:[%s3366_s4 + $0x38] sm:$0xff] }
  0x9b   :  { %2289 = vmatprep.subr.bf16.mxu0 %v2288_v55  ;;  %2231 = vmatpush3.bf16.msra.mxu1 %v2228_v60  ;;  %v2240_v18 = vpack.c.bf16 %v230_v6, %v229_v14  ;;  %v783_v14 = vld [vmem:[%s3370_s8 + $0x90] sm:$0xff]  ;;  %v784_v6 = vld [vmem:[%s3370_s8 + $0x98] sm:$0xff] }
  0x9c   :  { %2233 = vmatprep.subr.bf16.mxu1 %v2232_v4 }
  0x9e   :  { %2291 = vmatpush3.bf16.msra.mxu0 %v2288_v55 }
  0x9f   :  { %2293 = vmatprep.subr.bf16.mxu0 %v2292_v61  ;;  %2235 = vmatpush3.bf16.msra.mxu1 %v2232_v4  ;;  %v781_v4 = vld [vmem:[%s3370_s8 + $0x80] sm:$0xff] }
  0xa0   :  { %2237 = vmatprep.subr.bf16.mxu1 %v2236_v11 }
  0xa2   :  { %2295 = vmatpush3.bf16.msra.mxu0 %v2292_v61 }
  0xa3   :  { %2297 = vmatprep.subr.bf16.mxu0 %v2296_v5  ;;  %2239 = vmatpush3.bf16.msra.mxu1 %v2236_v11 }
  0xa4   :  { %2241 = vmatprep.subr.bf16.mxu1 %v2240_v18 }
  0xa5   :  { %1917 = vmatmul.mubr.f32.vlgmr.msra.gmra.mrb[4].mxu0 %v2874_v2  ;;  %v504_v2 = vld [vmem:[%s3368_s6 + $0x38] sm:$0xff] }
  0xa6   :  { %2299 = vmatpush3.bf16.msra.mxu0 %v2296_v5  ;;  %v2308_v25 = vpack.c.bf16 %v504_v2, %v503_v22  ;;  %v782_v5 = vld [vmem:[%s3370_s8 + $0x88] sm:$0xff]  ;;  %v1054_v22 = vld [vmem:[%s3372_s10 + $0xb8] sm:$0xff] }
  0xa7   :  { %2301 = vmatprep.subr.bf16.mxu0 %v2300_v13  ;;  %2243 = vmatpush3.bf16.msra.mxu1 %v2240_v18  ;;  %v2332_v11 = vpack.c.bf16 %v782_v5, %v781_v4  ;;  %v2336_v18 = vpack.c.bf16 %v784_v6, %v783_v14 }
  0xa8   :  { %2245 = vmatprep.subr.bf16.mxu1 %v2244_v24 }
  0xaa   :  { %2303 = vmatpush3.bf16.msra.mxu0 %v2300_v13  ;;  %v2404_v13 = vpack.c.bf16 %v1050_v9, %v1049_v8  ;;  %v770_v8 = vld [vmem:[%s3370_s8 + $0x28] sm:$0xff] }
  0xab   :  { %2305 = vmatprep.subr.bf16.mxu0 %v2304_v19  ;;  %2247 = vmatpush3.bf16.msra.mxu1 %v2244_v24  ;;  %v2412_v24 = vpack.c.bf16 %v1054_v22, %v1053_v21  ;;  %v775_v21 = vld [vmem:[%s3370_s8 + $0x50] sm:$0xff]  ;;  %v776_v22 = vld [vmem:[%s3370_s8 + $0x58] sm:$0xff] }
  0xac   :  { %2249 = vmatprep.subr.bf16.mxu1 %v2248_v30 }
  0xae   :  { %2307 = vmatpush3.bf16.msra.mxu0 %v2304_v19  ;;  %v2408_v19 = vpack.c.bf16 %v1052_v17, %v1051_v15  ;;  %v773_v15 = vld [vmem:[%s3370_s8 + $0x40] sm:$0xff]  ;;  %v774_v17 = vld [vmem:[%s3370_s8 + $0x48] sm:$0xff] }
  0xaf   :  { %2309 = vmatprep.subr.bf16.mxu0 %v2308_v25  ;;  %2251 = vmatpush3.bf16.msra.mxu1 %v2248_v30  ;;  %v789_v30 = vld [vmem:[%s3370_s8 + $0xc0] sm:$0xff] }
  0xb0   :  { %2253 = vmatprep.subr.bf16.mxu1 %v2252_v36 }
  0xb2   :  { %2311 = vmatpush3.bf16.msra.mxu0 %v2308_v25  ;;  %v787_v25 = vld [vmem:[%s3370_s8 + $0xb0] sm:$0xff] }
  0xb3   :  { %2313 = vmatprep.subr.bf16.mxu0 %v2312_v31  ;;  %2255 = vmatpush3.bf16.msra.mxu1 %v2252_v36  ;;  %v791_v36 = vld [vmem:[%s3370_s8 + $0xd0] sm:$0xff] }
  0xb4   :  { %2257 = vmatprep.subr.bf16.mxu1 %v2256_v42 }
  0xb6   :  { %2315 = vmatpush3.bf16.msra.mxu0 %v2312_v31  ;;  %v790_v31 = vld [vmem:[%s3370_s8 + $0xc8] sm:$0xff] }
  0xb7   :  { %2317 = vmatprep.subr.bf16.mxu0 %v2316_v37  ;;  %2259 = vmatpush3.bf16.msra.mxu1 %v2256_v42  ;;  %v2348_v34 = vpack.c.bf16 %v790_v31, %v789_v30  ;;  %v793_v42 = vld [vmem:[%s3370_s8 + $0xe0] sm:$0xff]  ;;  %v2388_v30 = vpack.c.bf16 %v778_v27, %v777_v26  ;;  %v1380_v27 = vld [vmem:[#allocation8 + $0x50] sm:$0xff] }
  0xba   :  { %2319 = vmatpush3.bf16.msra.mxu0 %v2316_v37  ;;  %v792_v37 = vld [vmem:[%s3370_s8 + $0xd8] sm:$0xff] }
  0xbb   :  { %2321 = vmatprep.subr.bf16.mxu0 %v2320_v43  ;;  %v2352_v40 = vpack.c.bf16 %v792_v37, %v791_v36 }
  0xbe   :  { %2323 = vmatpush3.bf16.msra.mxu0 %v2320_v43  ;;  %v794_v43 = vld [vmem:[%s3370_s8 + $0xe8] sm:$0xff] }
  0xbf   :  { %2325 = vmatprep.subr.bf16.mxu0 %v2324_v46 }
  0xc2   :  { %2327 = vmatpush3.bf16.msra.mxu0 %v2324_v46  ;;  %v2356_v46 = vpack.c.bf16 %v794_v43, %v793_v42  ;;  %v1387_v42 = vld [vmem:[#allocation8 + $0x88] sm:$0xff] }
 0x154   :  { %v1806_v47 = vpop.f32.mrb[0].mxu0 }
 0x155   :  { %v214_v48 = vpop.f32.mrb[1].mxu0 }
 0x156   :  { %1874 = vmatprep.mubr.f32.mxu1 %v214_v48  ;;  %v795_v48 = vld [vmem:[%s3370_s8 + $0xf0] sm:$0xff] }
 0x157   :  { %1875 = vmatmul.mubr.f32.vlgmr.msra.gmra.mrb[0].mxu1 %v1806_v47  ;;  %v2428_v47 = vpack.c.bf16 %v1062_v45, %v1061_v44  ;;  %v1388_v44 = vld [vmem:[#allocation8 + $0x90] sm:$0xff]  ;;  %v1389_v45 = vld [vmem:[#allocation8 + $0x98] sm:$0xff] }
 0x158   :  { %v1883_v49 = vpop.f32.mrb[2].mxu0  ;;  %1958 = vmatprep.mubr.msk.f32.mxu1 %vm141_vm0, %v2879_v3  ;;  %v1047_v3 = vld [vmem:[%s3372_s10 + $0x80] sm:$0xff] }
 0x159   :  { %v488_v50 = vpop.f32.mrb[3].mxu0 }
 0x15a   :  { %1951 = vmatprep.mubr.f32.mxu0 %v488_v50  ;;  %v1031_v50 = vld [vmem:[%s3372_s10] sm:$0xff] }
 0x15b   :  { %1952 = vmatmul.mubr.f32.vlgmr.msra.gmra.mrb[4].mxu0 %v1883_v49  ;;  %v796_v49 = vld [vmem:[%s3370_s8 + $0xf8] sm:$0xff] }
 0x15c   :  { %2035 = vmatprep.mubr.msk.f32.mxu0 %vm141_vm0, %v2919_v16  ;;  %v1048_v16 = vld [vmem:[%s3372_s10 + $0x88] sm:$0xff] }
 0x15d   :  { %v2400_v0 = vpack.c.bf16 %v1048_v16, %v1047_v3  ;;  %v1033_v3 = vld [vmem:[%s3372_s10 + $0x10] sm:$0xff]  ;;  %v1034_v16 = vld [vmem:[%s3372_s10 + $0x18] sm:$0xff] }
 0x22a   :  { %v1876_v52 = vpop.f32.mrb[0].mxu1 }
 0x22b   :  { %v3115_v53 = vadd.f32 %v1876_v52, %v1585_v51  ;;  %v396_v54 = vpop.f32.mrb[1].mxu1  ;;  %v2360_v52 = vpack.c.bf16 %v796_v49, %v795_v48  ;;  %v1391_v48 = vld [vmem:[#allocation8 + $0xa8] sm:$0xff] }
 0x22c   :  { %v412_v55 = vadd.f32 %v1585_v51, %v396_v54  ;;  %v1032_v51 = vld [vmem:[%s3372_s10 + $0x8] sm:$0xff] }
 0x22d   :  { %v415_v57 = vmax.f32 %v3115_v53, 0.0  ;;  %v2432_v54 = vpack.c.bf16 %v1032_v51, %v1031_v50  ;;  %v772_v53 = vld [vmem:[%s3370_s8 + $0x38] sm:$0xff] }
 0x22e   :  { %v414_v58 = vmax.f32 %v412_v55, 0.0  ;;  %v1953_v59 = vpop.f32.mrb[4].mxu0  ;;  %v765_v55 = vld [vmem:[%s3370_s8] sm:$0xff]  ;;  %v1392_v50 = vld [vmem:[#allocation8 + $0xb0] sm:$0xff] }
 0x22f   :  { %v3124_v60 = vadd.f32 %v1953_v59, %v1588_v56  ;;  %v670_v61 = vpop.f32.mrb[5].mxu0  ;;  %v2436_v59 = vpack.c.bf16 %v1034_v16, %v1033_v3  ;;  %v1393_v51 = vld [vmem:[#allocation8 + $0xb8] sm:$0xff]  ;;  %v1396_v3 = vld [vmem:[#allocation8 + $0xd0] sm:$0xff] }
 0x230   :  { %v2396_v62 = vpack.c.bf16 %v415_v57, %v414_v58  ;;  %v686_v63 = vadd.f32 %v1588_v56, %v670_v61  ;;  %v766_v56 = vld [vmem:[%s3370_s8 + $0x8] sm:$0xff]  ;;  %v767_v61 = vld [vmem:[%s3370_s8 + $0x10] sm:$0xff]  ;;  %v1397_v16 = vld [vmem:[#allocation8 + $0xd8] sm:$0xff] }
 0x231   :  { %v689_v1 = vmax.f32 %v3124_v60, 0.0  ;;  %v1037_v60 = vld [vmem:[%s3372_s10 + $0x30] sm:$0xff] }
 0x232   :  { %v688_v7 = vmax.f32 %v686_v63, 0.0  ;;  %2397 = vmatprep.subr.bf16.mxu0 %v2396_v62  ;;  %v1035_v63 = vld [vmem:[%s3372_s10 + $0x20] sm:$0xff] }
 0x233   :  { %2399 = vmatpush3.bf16.msra.mxu0 %v2396_v62  ;;  %v768_v62 = vld [vmem:[%s3370_s8 + $0x18] sm:$0xff] }
 0x234   :  { %v2328_v10 = vpack.c.bf16 %v689_v1, %v688_v7  ;;  %2401 = vmatprep.subr.bf16.mxu0 %v2400_v0  ;;  %v2368_v4 = vpack.c.bf16 %v768_v62, %v767_v61  ;;  %v1399_v61 = vld [vmem:[#allocation8 + $0xe8] sm:$0xff] }
 0x236   :  { %2329 = vmatprep.subr.bf16.mxu1 %v2328_v10  ;;  %2036 = vmatmul.mubr.msk.f32.vlgmr.msra.gmra.mrb[6].mxu0 %vm141_vm0, %v2940_v23  ;;  %v786_v23 = vld [vmem:[%s3370_s8 + $0xa8] sm:$0xff] }
 0x237   :  { %2331 = vmatpush3.bf16.msra.mxu1 %v2328_v10  ;;  %2403 = vmatpush3.bf16.msra.mxu0 %v2400_v0  ;;  %v2340_v2 = vpack.c.bf16 %v786_v23, %v785_v20  ;;  %v1036_v0 = vld [vmem:[%s3372_s10 + $0x28] sm:$0xff]  ;;  %v2380_v20 = vpack.c.bf16 %v774_v17, %v773_v15  ;;  %v1372_v17 = vld [vmem:[#allocation8 + $0x10] sm:$0xff] }
 0x238   :  { %2070 = vmatprep.mubr.f32.mxu0 %v688_v7  ;;  %2333 = vmatprep.subr.bf16.mxu1 %v2332_v11  ;;  %v2440_v5 = vpack.c.bf16 %v1036_v0, %v1035_v63  ;;  %v769_v7 = vld [vmem:[%s3370_s8 + $0x20] sm:$0xff] }
 0x239   :  { %2405 = vmatprep.subr.bf16.mxu0 %v2404_v13  ;;  %v2372_v9 = vpack.c.bf16 %v770_v8, %v769_v7  ;;  %v1594_v63 = vld [vmem:[#allocation7] ss:$0 sm:$0xff]  ;;  %v1591_v8 = vld [vmem:[#allocation5] ss:$0 sm:$0xff] }
 0x23a   :  { %1959 = vmatmul.mubr.msk.f32.vlgmr.msra.gmra.mrb[2].mxu1 %vm141_vm0, %v2908_v12  ;;  %v788_v12 = vld [vmem:[%s3370_s8 + $0xb8] sm:$0xff] }
 0x23b   :  { %2335 = vmatpush3.bf16.msra.mxu1 %v2332_v11  ;;  %1993 = vmatprep.mubr.f32.mxu1 %v414_v58  ;;  %v2344_v28 = vpack.c.bf16 %v788_v12, %v787_v25  ;;  %v2364_v58 = vpack.c.bf16 %v766_v56, %v765_v55  ;;  %v771_v11 = vld [vmem:[%s3370_s8 + $0x30] sm:$0xff]  ;;  %v2384_v25 = vpack.c.bf16 %v776_v22, %v775_v21 }
 0x23c   :  { %2407 = vmatpush3.bf16.msra.mxu0 %v2404_v13  ;;  %2337 = vmatprep.subr.bf16.mxu1 %v2336_v18  ;;  %v1040_v13 = vld [vmem:[%s3372_s10 + $0x48] sm:$0xff]  ;;  %v2376_v14 = vpack.c.bf16 %v772_v53, %v771_v11  ;;  %v1222_v53 = vld [vmem:[%s3374_s12] sm:$0xff]  ;;  %v1376_v22 = vld [vmem:[#allocation8 + $0x30] sm:$0xff] }
 0x23d   :  { %2409 = vmatprep.subr.bf16.mxu0 %v2408_v19  ;;  %v1395_v55 = vld [vmem:[#allocation8 + $0xc8] sm:$0xff] }
 0x23f   :  { %2339 = vmatpush3.bf16.msra.mxu1 %v2336_v18  ;;  %v1041_v18 = vld [vmem:[%s3372_s10 + $0x50] sm:$0xff] }
 0x240   :  { %2411 = vmatpush3.bf16.msra.mxu0 %v2408_v19  ;;  %2341 = vmatprep.subr.bf16.mxu1 %v2340_v2  ;;  %v1042_v19 = vld [vmem:[%s3372_s10 + $0x58] sm:$0xff] }
 0x241   :  { %2413 = vmatprep.subr.bf16.mxu0 %v2412_v24  ;;  %v2452_v23 = vpack.c.bf16 %v1042_v19, %v1041_v18  ;;  %v1373_v18 = vld [vmem:[#allocation8 + $0x18] sm:$0xff] }
 0x242   :  { %v2498_v19 = vpack.c.bf16 %v1373_v18, %v1372_v17 }
 0x243   :  { %2343 = vmatpush3.bf16.msra.mxu1 %v2340_v2  ;;  %v1043_v2 = vld [vmem:[%s3372_s10 + $0x60] sm:$0xff] }
 0x244   :  { %2415 = vmatpush3.bf16.msra.mxu0 %v2412_v24  ;;  %2345 = vmatprep.subr.bf16.mxu1 %v2344_v28  ;;  %v1044_v24 = vld [vmem:[%s3372_s10 + $0x68] sm:$0xff] }
 0x245   :  { %2417 = vmatprep.subr.bf16.mxu0 %v2416_v29  ;;  %v2456_v12 = vpack.c.bf16 %v1044_v24, %v1043_v2  ;;  %v1377_v2 = vld [vmem:[#allocation8 + $0x38] sm:$0xff] }
 0x246   :  { %v2504_v24 = vpack.c.bf16 %v1377_v2, %v1376_v22 }
 0x247   :  { %2347 = vmatpush3.bf16.msra.mxu1 %v2344_v28  ;;  %v1045_v28 = vld [vmem:[%s3372_s10 + $0x70] sm:$0xff] }
 0x248   :  { %2419 = vmatpush3.bf16.msra.mxu0 %v2416_v29  ;;  %2349 = vmatprep.subr.bf16.mxu1 %v2348_v34  ;;  %v1046_v29 = vld [vmem:[%s3372_s10 + $0x78] sm:$0xff] }
 0x249   :  { %2421 = vmatprep.subr.bf16.mxu0 %v2420_v35  ;;  %v2460_v31 = vpack.c.bf16 %v1046_v29, %v1045_v28  ;;  %v1381_v28 = vld [vmem:[#allocation8 + $0x58] sm:$0xff] }
 0x24a   :  { %v2510_v29 = vpack.c.bf16 %v1381_v28, %v1380_v27 }
 0x24b   :  { %2351 = vmatpush3.bf16.msra.mxu1 %v2348_v34  ;;  %v2392_v34 = vpack.c.bf16 %v780_v33, %v779_v32  ;;  %v1384_v33 = vld [vmem:[#allocation8 + $0x70] sm:$0xff] }
 0x24c   :  { %2423 = vmatpush3.bf16.msra.mxu0 %v2420_v35  ;;  %2353 = vmatprep.subr.bf16.mxu1 %v2352_v40 }
 0x24d   :  { %2425 = vmatprep.subr.bf16.mxu0 %v2424_v41 }
 0x24f   :  { %2355 = vmatpush3.bf16.msra.mxu1 %v2352_v40  ;;  %v2689_v40 = vmov 0.0  }
 0x250   :  { %2427 = vmatpush3.bf16.msra.mxu0 %v2424_v41  ;;  %2357 = vmatprep.subr.bf16.mxu1 %v2356_v46  ;;  %v1386_v41 = vld [vmem:[#allocation8 + $0x80] sm:$0xff] }
 0x251   :  { %2429 = vmatprep.subr.bf16.mxu0 %v2428_v47  ;;  %v2471_v43 = vpack.c.bf16 %v1387_v42, %v1386_v41 }
 0x253   :  { %2359 = vmatpush3.bf16.msra.mxu1 %v2356_v46  ;;  %v2474_v46 = vpack.c.bf16 %v1389_v45, %v1388_v44 }
 0x254   :  { %2431 = vmatpush3.bf16.msra.mxu0 %v2428_v47  ;;  %2361 = vmatprep.subr.bf16.mxu1 %v2360_v52  ;;  %v1390_v47 = vld [vmem:[#allocation8 + $0xa0] sm:$0xff] }
 0x255   :  { %2433 = vmatprep.subr.bf16.mxu0 %v2432_v54  ;;  %v2477_v49 = vpack.c.bf16 %v1391_v48, %v1390_v47  ;;  %v1597_v47 = vld [vmem:[#allocation10] ss:$0 sm:$0xff] }
 0x257   :  { %2071 = vmatmul.mubr.f32.vlgmr.msra.gmra.mrb[8].mxu0 %v689_v1  ;;  %2363 = vmatpush3.bf16.msra.mxu1 %v2360_v52  ;;  %v1038_v1 = vld [vmem:[%s3372_s10 + $0x38] sm:$0xff]  ;;  %v2480_v52 = vpack.c.bf16 %v1393_v51, %v1392_v50  ;;  %v1598_v51 = vld [vmem:[#allocation11] ss:$0 sm:$0xff] }
 0x258   :  { %2435 = vmatpush3.bf16.msra.mxu0 %v2432_v54  ;;  %2365 = vmatprep.subr.bf16.mxu1 %v2364_v58  ;;  %v2444_v10 = vpack.c.bf16 %v1038_v1, %v1037_v60  ;;  %v1394_v54 = vld [vmem:[#allocation8 + $0xc0] sm:$0xff] }
 0x259   :  { %2437 = vmatprep.subr.bf16.mxu0 %v2436_v59  ;;  %v2483_v56 = vpack.c.bf16 %v1395_v55, %v1394_v54  ;;  %v2690_v54 = vmov 0   ;;  %v1599_v55 = vld [vmem:[#allocation2] ss:$0 sm:$0xff] }
 0x25a   :  { %1994 = vmatmul.mubr.f32.vlgmr.msra.gmra.mrb[4].mxu1 %v415_v57  ;;  %v1039_v57 = vld [vmem:[%s3372_s10 + $0x40] sm:$0xff]  ;;  %2538 = vset.pattern.permute.xlu0 %v2690_v54 }
 0x25b   :  { %2367 = vmatpush3.bf16.msra.mxu1 %v2364_v58  ;;  %v2448_v6 = vpack.c.bf16 %v1040_v13, %v1039_v57  ;;  %v2486_v58 = vpack.c.bf16 %v1397_v16, %v1396_v3  ;;  %v1370_v57 = vld [vmem:[#allocation8] sm:$0xff]  ;;  %v1371_v13 = vld [vmem:[#allocation8 + $0x8] sm:$0xff] }
 0x25c   :  { %2439 = vmatpush3.bf16.msra.mxu0 %v2436_v59  ;;  %2369 = vmatprep.subr.bf16.mxu1 %v2368_v4  ;;  %v1398_v59 = vld [vmem:[#allocation8 + $0xe0] sm:$0xff]  ;;  %v2495_v15 = vpack.c.bf16 %v1371_v13, %v1370_v57 }
 0x25d   :  { %2441 = vmatprep.subr.bf16.mxu0 %v2440_v5  ;;  %v2489_v62 = vpack.c.bf16 %v1399_v61, %v1398_v59 }
 0x25f   :  { %2371 = vmatpush3.bf16.msra.mxu1 %v2368_v4 }
 0x260   :  { %2443 = vmatpush3.bf16.msra.mxu0 %v2440_v5  ;;  %2373 = vmatprep.subr.bf16.mxu1 %v2372_v9 }
 0x261   :  { %2445 = vmatprep.subr.bf16.mxu0 %v2444_v10 }
 0x263   :  { %2375 = vmatpush3.bf16.msra.mxu1 %v2372_v9 }
 0x264   :  { %2447 = vmatpush3.bf16.msra.mxu0 %v2444_v10  ;;  %2377 = vmatprep.subr.bf16.mxu1 %v2376_v14 }
 0x265   :  { %2449 = vmatprep.subr.bf16.mxu0 %v2448_v6 }
 0x267   :  { %2379 = vmatpush3.bf16.msra.mxu1 %v2376_v14 }
 0x268   :  { %2451 = vmatpush3.bf16.msra.mxu0 %v2448_v6  ;;  %2381 = vmatprep.subr.bf16.mxu1 %v2380_v20  ;;  %v1296_v6 = vld [vmem:[%s3375_s13] sm:$0xff] }
 0x269   :  { %2453 = vmatprep.subr.bf16.mxu0 %v2452_v23 }
 0x26b   :  { %2383 = vmatpush3.bf16.msra.mxu1 %v2380_v20  ;;  %v1374_v20 = vld [vmem:[#allocation8 + $0x20] sm:$0xff] }
 0x26c   :  { %2455 = vmatpush3.bf16.msra.mxu0 %v2452_v23  ;;  %2385 = vmatprep.subr.bf16.mxu1 %v2384_v25  ;;  %v1375_v23 = vld [vmem:[#allocation8 + $0x28] sm:$0xff] }
 0x26d   :  { %2457 = vmatprep.subr.bf16.mxu0 %v2456_v12  ;;  %v2501_v21 = vpack.c.bf16 %v1375_v23, %v1374_v20 }
 0x26f   :  { %2387 = vmatpush3.bf16.msra.mxu1 %v2384_v25  ;;  %v1378_v25 = vld [vmem:[#allocation8 + $0x40] sm:$0xff] }
 0x270   :  { %2459 = vmatpush3.bf16.msra.mxu0 %v2456_v12  ;;  %2389 = vmatprep.subr.bf16.mxu1 %v2388_v30  ;;  %v1379_v12 = vld [vmem:[#allocation8 + $0x48] sm:$0xff] }
 0x271   :  { %2461 = vmatprep.subr.bf16.mxu0 %v2460_v31  ;;  %v2507_v26 = vpack.c.bf16 %v1379_v12, %v1378_v25 }
 0x273   :  { %2391 = vmatpush3.bf16.msra.mxu1 %v2388_v30  ;;  %v1382_v30 = vld [vmem:[#allocation8 + $0x60] sm:$0xff] }
 0x274   :  { %2463 = vmatpush3.bf16.msra.mxu0 %v2460_v31  ;;  %2393 = vmatprep.subr.bf16.mxu1 %v2392_v34  ;;  %v1383_v31 = vld [vmem:[#allocation8 + $0x68] sm:$0xff] }
 0x275   :  { %2470 = vmatprep.subr.bf16.mxu0 %v2687_v39  ;;  %v2513_v32 = vpack.c.bf16 %v1383_v31, %v1382_v30 }
 0x277   :  { %2395 = vmatpush3.bf16.msra.mxu1 %v2392_v34  ;;  %v1385_v34 = vld [vmem:[#allocation8 + $0x78] sm:$0xff] }
 0x278   :  { %2464 = vmatprep.subr.bf16.mxu1 %v2687_v39 }
 0x309   :  { %v2037_v35 = vpop.f32.mrb[6].mxu0 }
 0x30a   :  { %v1022_v36 = vpop.f32.mrb[7].mxu0 }
 0x30b   :  { %2105 = vmatprep.mubr.f32.mxu0 %v1022_v36  ;;  %v1400_v36 = vld [vmem:[#allocation8 + $0xf0] sm:$0xff] }
 0x30c   :  { %2106 = vmatmul.mubr.f32.vlgmr.msra.gmra.mrb[8].mxu0 %v2037_v35  ;;  %v2516_v35 = vpack.c.bf16 %v1385_v34, %v1384_v33 }
 0x30d   :  { %v1960_v37 = vpop.f32.mrb[2].mxu1  ;;  %2154 = vmatprep.mubr.msk.f32.mxu0 %vm2688_vm1, %v2689_v40  ;;  %2472 = vmatpush3.bf16.msra.mxu0 %v2471_v43 }
 0x30e   :  { %v756_v38 = vpop.f32.mrb[3].mxu1  ;;  %2473 = vmatprep.subr.bf16.mxu0 %v2687_v39 }
 0x30f   :  { %2028 = vmatprep.mubr.f32.mxu1 %v756_v38 }
 0x310   :  { %2029 = vmatmul.mubr.f32.vlgmr.msra.gmra.mrb[4].mxu1 %v1960_v37  ;;  %v1401_v37 = vld [vmem:[#allocation8 + $0xf8] sm:$0xff] }
 0x311   :  { %2112 = vmatprep.mubr.msk.f32.mxu1 %vm2688_vm1, %v2689_v40  ;;  %2475 = vmatpush3.bf16.msra.mxu0 %v2474_v46  ;;  %v2492_v38 = vpack.c.bf16 %v1401_v37, %v1400_v36 }
 0x312   :  { %2476 = vmatprep.subr.bf16.mxu0 %v2687_v39 }
 0x315   :  { %2478 = vmatpush3.bf16.msra.mxu0 %v2477_v49 }
 0x316   :  { %2479 = vmatprep.subr.bf16.mxu0 %v2687_v39 }
 0x319   :  { %2481 = vmatpush3.bf16.msra.mxu0 %v2480_v52 }
 0x31a   :  { %2482 = vmatprep.subr.bf16.mxu0 %v2687_v39 }
 0x31d   :  { %2484 = vmatpush3.bf16.msra.mxu0 %v2483_v56 }
 0x31e   :  { %2485 = vmatprep.subr.bf16.mxu0 %v2687_v39 }
 0x321   :  { %2487 = vmatpush3.bf16.msra.mxu0 %v2486_v58 }
 0x322   :  { %2488 = vmatprep.subr.bf16.mxu0 %v2687_v39 }
 0x325   :  { %2490 = vmatpush3.bf16.msra.mxu0 %v2489_v62 }
 0x326   :  { %2491 = vmatprep.subr.bf16.mxu0 %v2687_v39 }
 0x329   :  { %2493 = vmatpush3.bf16.msra.mxu0 %v2492_v38 }
 0x3df   :  { %v2107_v0 = vpop.f32.mrb[8].mxu0 }
 0x3e0   :  { %v1221_v4 = vadd.f32 %v2107_v0, %v1594_v63  ;;  %v1204_v5 = vpop.f32.mrb[9].mxu0 }
 0x3e1   :  { %v1220_v7 = vadd.f32 %v1594_v63, %v1204_v5 }
 0x3e3   :  { %v2465_v60 = vpack.c.bf16 %v1221_v4, %v1220_v7  ;;  %v2030_v1 = vpop.f32.mrb[4].mxu1 }
 0x3e4   :  { %v955_v9 = vadd.f32 %v2030_v1, %v1591_v8  ;;  %v938_v10 = vpop.f32.mrb[5].mxu1 }
 0x3e5   :  { %v954_v11 = vadd.f32 %v1591_v8, %v938_v10  ;;  %2466 = vmatpush3.bf16.msra.mxu1 %v2465_v60 }
 0x3e6   :  { %2467 = vmatprep.subr.bf16.mxu1 %v2687_v39 }
 0x3e7   :  { %v2468_v14 = vpack.c.bf16 %v955_v9, %v954_v11 }
 0x3e8   :  { %2113 = vmatmul.mubr.msk.f32.vlgmr.msra.gmra.mrb[6].mxu1 %vm141_vm0, %v1222_v53 }
 0x3e9   :  { %2469 = vmatpush3.bf16.msra.mxu1 %v2468_v14  ;;  %2119 = vmatprep.mubr.msk.f32.mxu1 %vm2688_vm1, %v2689_v40 }
 0x3ea   :  { %2494 = vmatprep.subr.bf16.mxu1 %v2687_v39 }
 0x3ec   :  { %2120 = vmatmul.mubr.msk.f32.vlgmr.msra.gmra.mrb[8].mxu1 %vm141_vm0, %v1296_v6 }
 0x3ed   :  { %2496 = vmatpush3.bf16.msra.mxu1 %v2495_v15  ;;  %2189 = vmatprep.mubr.msk.f32.mxu1 %vm2688_vm1, %v2689_v40 }
 0x3ee   :  { %2497 = vmatprep.subr.bf16.mxu1 %v2687_v39 }
 0x3f1   :  { %2499 = vmatpush3.bf16.msra.mxu1 %v2498_v19 }
 0x3f2   :  { %2500 = vmatprep.subr.bf16.mxu1 %v2687_v39 }
 0x3f5   :  { %2502 = vmatpush3.bf16.msra.mxu1 %v2501_v21 }
 0x3f6   :  { %2503 = vmatprep.subr.bf16.mxu1 %v2687_v39 }
 0x3f9   :  { %2505 = vmatpush3.bf16.msra.mxu1 %v2504_v24 }
 0x3fa   :  { %2506 = vmatprep.subr.bf16.mxu1 %v2687_v39 }
 0x3fd   :  { %2508 = vmatpush3.bf16.msra.mxu1 %v2507_v26 }
 0x3fe   :  { %2509 = vmatprep.subr.bf16.mxu1 %v2687_v39 }
 0x401   :  { %2511 = vmatpush3.bf16.msra.mxu1 %v2510_v29 }
 0x402   :  { %2512 = vmatprep.subr.bf16.mxu1 %v2687_v39 }
 0x405   :  { %2514 = vmatpush3.bf16.msra.mxu1 %v2513_v32 }
 0x406   :  { %2515 = vmatprep.subr.bf16.mxu1 %v2687_v39 }
 0x409   :  { %2517 = vmatpush3.bf16.msra.mxu1 %v2516_v35 }
 0x4bb   :  { %v1292_v40 = vpop.f32.mrb[6].mxu1 }
 0x4bc   :  { %v2114_v41 = vpop.f32.mrb[7].mxu1  ;;  %2190 = vmatmul.mubr.f32.vlgmr.msra.gmra.mrb[10].mxu1 %v1292_v40 }
 0x4bf   :  { %v1366_v42 = vpop.f32.mrb[8].mxu1 }
 0x4c0   :  { %v2121_v43 = vpop.f32.mrb[9].mxu1  ;;  %2155 = vmatmul.mubr.f32.vlgmr.msra.gmra.mrb[10].mxu0 %v1366_v42 }
 0x58f   :  { %v1538_v44 = vpop.f32.mrb[10].mxu1 }
 0x590   :  { %v2191_v45 = vpop.f32.mrb[11].mxu1 }
 0x593   :  { %v1468_v46 = vpop.f32.mrb[10].mxu0 }
 0x594   :  { %v1539_v48 = vadd.f32 %v1538_v44, %v1468_v46  ;;  %v2156_v49 = vpop.f32.mrb[11].mxu0 }
 0x596   :  { %v1549_v50 = vadd.f32 %v1597_v47, %v1539_v48 }
 0x598   :  { %v1550_v39 = vmax.f32 %v1549_v50, 0.0 }
 0x59a   :  { %v1558_v52 = vmul.f32 %v1598_v51, %v1550_v39 }
 0x59c   :  { %1559 = vadd.xlane.f32.xlu0 %v1558_v52 }
 0x629   :  { %v1560_v56 = vpop.xlane.xlu0 %1559 }
 0x62a   :  { %v1568_v3 = vadd.f32 %v1599_v55, %v1560_v56 }
 0x62c   :  { %1571 = vperm.xlu0 %2538, %v1568_v3  }
 0x6ab   :  { %v1572_v16 = vpop.permute.xlu0 %1571 }
 0x6ac   :  { %1574 = vst [vmem:[%s3380_s18] sm:$0xff] %v1572_v16 }
 0x6ad   :  { %1579 = vsyncpa [#allocation4], 1 }
 0x6ae   :  { %1580 = vsyncpa [#allocation6], 1 }
 0x6af   :  { %1581 = vsyncpa [#allocation9], 1 }
 0x6b0   :  { %1582 = vsyncpa [#allocation12], 1 }

</bundles_post_ra>
